<compile_context>
chip_gen: v7x
topology: tpu7x:2x2x1
jax: 0.10.0
libtpu: 0.0.40
codegen_flags: <defaults>
</compile_context>

<pallas_src>
import functools
import math

import jax
import jax.numpy as jnp
import numpy as np
from jax.experimental import pallas as pl
from jax.experimental.pallas import tpu as pltpu

N_HEAD = 4
EPS = 1e-6
NEG_INF = -1e9  # torch masked_fill value (-1000000000.0)


# ----------------------------------------------------------------------------
# In-kernel helpers
# ----------------------------------------------------------------------------
def _layer_norm(h, a, b, eps):
  """Custom LayerNorm a*(h-mean)/(std+eps)+b with unbiased std.

  The divide is a multiply by an EUP reciprocal (keeps it off the VPU)."""
  n = h.shape[-1]
  mean = jnp.mean(h, axis=-1, keepdims=True)
  diff = h - mean
  var = jnp.sum(diff * diff, axis=-1, keepdims=True) * (1.0 / (n - 1))
  inv = pl.reciprocal(jnp.sqrt(var) + eps, approx=True)
  return a * diff * inv + b


def _cross_encoder_kernel(
    x_ref, y_ref, mask_ref,
    wq_ref, bq_ref, wkv_ref, bkv_ref, wo_ref, bo_ref,
    ln1_a_ref, ln1_b_ref,
    w1_ref, b1_ref, w2_ref, b2_ref,
    ln2_a_ref, ln2_b_ref,
    out_ref,
    *, bt, lq, lk, n_head, d_k, eps):
  """One grid step == `bt` batch elements; the whole layer runs out of VMEM."""
  hid = n_head * d_k
  mq = bt * lq

  x = x_ref[...]                                    # (bt*lq, H) f32
  xb = x.astype(jnp.bfloat16)
  yb = y_ref[...].astype(jnp.bfloat16)              # (bt*lk, H) bf16

  # ---- fused Q and K|V projections on the flattened row slab --------------
  # bf16 operands feed the MXU at native rate; accumulate in f32.
  q = jnp.dot(xb, wq_ref[...], preferred_element_type=jnp.float32) + bq_ref[...]
  kv = jnp.dot(yb, wkv_ref[...], preferred_element_type=jnp.float32) + bkv_ref[...]

  # 1/sqrt(d_k) was folded into wq/bq at parameter-prep time.
  # (Lq is a multiple of 8 at the demo shapes, so these leading-dim
  #  reshapes are layout-trivial.)
  q3 = q.reshape(bt, lq, hid).astype(jnp.bfloat16)
  k3 = kv[:, :hid].reshape(bt, lk, hid).astype(jnp.bfloat16)
  v3 = kv[:, hid:].reshape(bt, lk, hid).astype(jnp.bfloat16)

  # Mask handling hoisted out of the head loop (mask == 0 => masked key).
  madd = jnp.where(mask_ref[...] == 0.0,
                   jnp.float32(NEG_INF), jnp.float32(0.0))     # (bt, 1, lk)
  madd = jnp.broadcast_to(madd, (bt, lq, lk))

  wo = wo_ref[...]                                  # (H, H) bf16, VMEM-resident
  attn = jnp.zeros((mq, hid), jnp.float32)
  for hh in range(n_head):                          # small static unroll
    sl = slice(hh * d_k, (hh + 1) * d_k)
    s = jnp.einsum('bqd,bkd->bqk', q3[:, :, sl], k3[:, :, sl],
                   preferred_element_type=jnp.float32)         # (bt, lq, lk)
    s = s + madd
    # softmax over keys; denominator reciprocal on the EUP slot.
    s = s - jnp.max(s, axis=-1, keepdims=True)
    e = jnp.exp(s)
    p = e * pl.reciprocal(jnp.sum(e, axis=-1, keepdims=True), approx=True)
    ctx = jnp.einsum('bqk,bkd->bqd', p.astype(jnp.bfloat16), v3[:, :, sl],
                     preferred_element_type=jnp.float32)       # (bt, lq, d_k)
    # Accumulate this head straight into the output projection:
    # no per-head concat / lane-axis relayout.
    attn = attn + jnp.dot(ctx.reshape(mq, d_k).astype(jnp.bfloat16),
                          wo[sl, :], preferred_element_type=jnp.float32)
  attn = attn + bo_ref[...]
  # TODO(synk): attention dropout is identity here (inference mode).

  # ---- residual + LayerNorm 1 (TwoInputSublayerConnection, dropout = id) --
  x1 = _layer_norm(x + attn, ln1_a_ref[...], ln1_b_ref[...], eps)

  # ---- position-wise feed-forward ------------------------------------------
  f = jnp.dot(x1.astype(jnp.bfloat16), w1_ref[...],
              preferred_element_type=jnp.float32) + b1_ref[...]
  f = jnp.maximum(f, 0.0)
  # TODO(synk): FFN / residual dropouts are identity here (inference mode).
  f = jnp.dot(f.astype(jnp.bfloat16), w2_ref[...],
              preferred_element_type=jnp.float32) + b2_ref[...]

  # ---- residual + LayerNorm 2 (SublayerConnection, dropout = id) ----------
  out_ref[...] = _layer_norm(x1 + f, ln2_a_ref[...], ln2_b_ref[...], eps)


# ----------------------------------------------------------------------------
# Host-side wrapper
# ----------------------------------------------------------------------------
def _pick_block_batch(B, Lq, Lk, row_cap=256):
  """Largest divisor Bt of B whose flattened (Bt*L, H) blocks stay legal
  (second-minor dim multiple of 8, or the full array) and Bt*Lq <= row_cap."""
  legal = [d for d in range(1, B + 1) if B % d == 0 and
           (((d * Lq) % 8 == 0 and (d * Lk) % 8 == 0) or d == B)]
  small = [d for d in legal if d * Lq <= row_cap]
  if small:
    return max(small)
  return min(legal) if legal else B


def prepare_params(params, n_head=N_HEAD):
  """One-time conversion of torch-style f32 params into kernel operands:
  fused K|V weight, 1/sqrt(d_k) folded into the Q projection, bf16 matmul
  weights, (1, H) bias / affine rows. Done once, NOT per forward call."""
  H = params['wq'].shape[0]
  d_k = H // n_head
  scale = jnp.float32(1.0 / math.sqrt(d_k))
  row = lambda v: v.reshape(1, -1).astype(jnp.float32)
  bf = lambda w: w.astype(jnp.bfloat16)
  wkv = jnp.concatenate([params['wk'], params['wv']], axis=1)
  bkv = jnp.concatenate([params['bk'], params['bv']], axis=0)
  return {
      'wq': bf(params['wq'] * scale), 'bq': row(params['bq'] * scale),
      'wkv': bf(wkv), 'bkv': row(bkv),
      'wo': bf(params['wo']), 'bo': row(params['bo']),
      'ln1_a': row(params['ln1_a']), 'ln1_b': row(params['ln1_b']),
      'w1': bf(params['w1']), 'b1': row(params['b1']),
      'w2': bf(params['w2']), 'b2': row(params['b2']),
      'ln2_a': row(params['ln2_a']), 'ln2_b': row(params['ln2_b']),
  }


def cross_encoder_forward(x, y, mask, prep):
  """Pallas implementation of CrossEncoderLayer.forward (inference).

  x:    (B, Lq, H) float32   queries
  y:    (B, Lk, H) float32   keys / values
  mask: (B, 1, Lk) float32   key-padding mask, 0 => masked position
  prep: output of prepare_params(params)
  """
  B, Lq, H = x.shape
  Lk = y.shape[1]
  assert H % N_HEAD == 0
  d_k = H // N_HEAD

  Bt = _pick_block_batch(B, Lq, Lk)
  grid = (B // Bt,)

  # Flattened row slabs (bitcast-level reshapes outside the kernel) so the
  # projections / FFN present Bt*Lq rows to the MXU and the output store is
  # one large DMA per step.
  x2 = x.reshape(B * Lq, H)
  y2 = y.reshape(B * Lk, H)

  # Weights / biases: whole-array VMEM residents (single copy for the whole
  # kernel; no per-step double-buffering of constant-index blocks).
  vmem_spec = lambda: pl.BlockSpec(memory_space=pltpu.MemorySpace.VMEM)

  kernel = functools.partial(_cross_encoder_kernel, bt=Bt, lq=Lq, lk=Lk,
                             n_head=N_HEAD, d_k=d_k, eps=EPS)

  flops = 2 * B * (Lq * H * H              # Q projection
                   + Lk * H * 2 * H        # fused K|V projection
                   + 2 * Lq * Lk * H       # scores + attn @ V (all heads)
                   + Lq * H * H            # output projection (accumulated)
                   + 2 * Lq * H * 2 * H)   # FFN (both matmuls)
  transcendentals = B * (N_HEAD * Lq * Lk + N_HEAD * Lq + 4 * Lq)
  w_list = [prep[k] for k in ('wq', 'bq', 'wkv', 'bkv', 'wo', 'bo',
                              'ln1_a', 'ln1_b', 'w1', 'b1', 'w2', 'b2',
                              'ln2_a', 'ln2_b')]
  bytes_accessed = int(4 * (x2.size + y2.size + mask.size + x2.size)
                       + sum(a.size * a.dtype.itemsize for a in w_list))

  out2 = pl.pallas_call(
      kernel,
      out_shape=jax.ShapeDtypeStruct((B * Lq, H), jnp.float32),
      grid=grid,
      in_specs=[
          pl.BlockSpec((Bt * Lq, H), lambda i: (i, 0)),     # x rows
          pl.BlockSpec((Bt * Lk, H), lambda i: (i, 0)),     # y rows
          pl.BlockSpec((Bt, 1, Lk), lambda i: (i, 0, 0)),   # mask
      ] + [vmem_spec() for _ in range(14)],                 # weights / biases
      out_specs=pl.BlockSpec((Bt * Lq, H), lambda i: (i, 0)),
      compiler_params=pltpu.CompilerParams(
          dimension_semantics=("parallel",),                # batch across TCs
          vmem_limit_bytes=64 * 1024 * 1024),               # headroom for big H
      cost_estimate=pl.CostEstimate(
          flops=int(flops), transcendentals=int(transcendentals),
          bytes_accessed=bytes_accessed),
  )(x2, y2, mask, *w_list)
  return out2.reshape(B, Lq, H)


# ----------------------------------------------------------------------------
# Pure-JAX reference (f32 mirror of the PyTorch module, inference)
# ----------------------------------------------------------------------------
def _softmax_ref(s):
  s = s - jnp.max(s, axis=-1, keepdims=True)
  e = jnp.exp(s)
  return e / jnp.sum(e, axis=-1, keepdims=True)


def _layer_norm_ref(x, a, b, eps):
  n = x.shape[-1]
  mean = jnp.mean(x, axis=-1, keepdims=True)
  var = jnp.sum((x - mean) ** 2, axis=-1, keepdims=True) / (n - 1)
  std = jnp.sqrt(var)
  return a * (x - mean) / (std + eps) + b


def cross_encoder_reference(x, y, mask, p):
  hi = jax.lax.Precision.HIGHEST
  B, Lq, H = x.shape
  Lk = y.shape[1]
  d_k = H // N_HEAD

  q = jnp.dot(x, p['wq'], precision=hi) + p['bq']
  k = jnp.dot(y, p['wk'], precision=hi) + p['bk']
  v = jnp.dot(y, p['wv'], precision=hi) + p['bv']
  q = q.reshape(B, Lq, N_HEAD, d_k).transpose(0, 2, 1, 3)
  k = k.reshape(B, Lk, N_HEAD, d_k).transpose(0, 2, 1, 3)
  v = v.reshape(B, Lk, N_HEAD, d_k).transpose(0, 2, 1, 3)

  scores = jnp.einsum('bhqd,bhkd->bhqk', q, k, precision=hi) / math.sqrt(d_k)
  scores = jnp.where(mask[:, :, None, :] == 0.0, NEG_INF, scores)
  attn = _softmax_ref(scores)
  ctx = jnp.einsum('bhqk,bhkd->bhqd', attn, v, precision=hi)
  ctx = ctx.transpose(0, 2, 1, 3).reshape(B, Lq, H)
  a = jnp.dot(ctx, p['wo'], precision=hi) + p['bo']

  x1 = _layer_norm_ref(x + a, p['ln1_a'], p['ln1_b'], EPS)
  f = jnp.maximum(jnp.dot(x1, p['w1'], precision=hi) + p['b1'], 0.0)
  f = jnp.dot(f, p['w2'], precision=hi) + p['b2']
  return _layer_norm_ref(x1 + f, p['ln2_a'], p['ln2_b'], EPS)


def init_params(key, n_hid):
  """Linear weights stored in (in, out) layout so the kernel does x @ W + b."""
  ks = jax.random.split(key, 14)

  def lin(k, fan_in, shape):
    bound = 1.0 / math.sqrt(fan_in)
    return jax.random.uniform(k, shape, jnp.float32, -bound, bound)

  return {
      'wq': lin(ks[0], n_hid, (n_hid, n_hid)), 'bq': lin(ks[1], n_hid, (n_hid,)),
      'wk': lin(ks[2], n_hid, (n_hid, n_hid)), 'bk': lin(ks[3], n_hid, (n_hid,)),
      'wv': lin(ks[4], n_hid, (n_hid, n_hid)), 'bv': lin(ks[5], n_hid, (n_hid,)),
      'wo': lin(ks[6], n_hid, (n_hid, n_hid)), 'bo': lin(ks[7], n_hid, (n_hid,)),
      'w1': lin(ks[8], n_hid, (n_hid, 2 * n_hid)),
      'b1': lin(ks[9], n_hid, (2 * n_hid,)),
      'w2': lin(ks[10], 2 * n_hid, (2 * n_hid, n_hid)),
      'b2': lin(ks[11], 2 * n_hid, (n_hid,)),
      # Torch inits LayerNorm affine to ones/zeros; perturb slightly so the
      # affine part of the correctness check is non-trivial.
      'ln1_a': 1.0 + 0.1 * jax.random.normal(ks[12], (n_hid,), jnp.float32),
      'ln1_b': 0.1 * jax.random.normal(ks[13], (n_hid,), jnp.float32),
      'ln2_a': jnp.ones((n_hid,), jnp.float32),
      'ln2_b': jnp.zeros((n_hid,), jnp.float32),
  }


if __name__ == "__main__":
  B, Lq, Lk, H = 2, 8, 16, 32        # n_head=4, d_k=8
  root = jax.random.PRNGKey(0)
  k_p, k_x, k_y = jax.random.split(root, 3)
  params = init_params(k_p, H)
  x = jax.random.normal(k_x, (B, Lq, H), jnp.float32)
  y = jax.random.normal(k_y, (B, Lk, H), jnp.float32)

  # Key-padding mask: batch 0 attends to all 16 keys, batch 1 to the first 11.
  lengths = jnp.array([16, 11], dtype=jnp.int32)
  mask = (jnp.arange(Lk)[None, :] < lengths[:, None]).astype(jnp.float32)
  mask = mask.reshape(B, 1, Lk)

  prep = prepare_params(params)      # one-time kernel-ready params (bf16 etc.)
  out = jax.block_until_ready(cross_encoder_forward(x, y, mask, prep))
  ref = jax.block_until_ready(cross_encoder_reference(x, y, mask, params))

  assert out.shape == (B, Lq, H), out.shape
  # bf16 MXU operands + approx EUP reciprocals vs. the f32 reference:
  # expected max deviation ~1e-2, so 5e-2 gives comfortable margin while
  # still catching any real semantic bug (those show up at O(0.1-1)).
  np.testing.assert_allclose(np.asarray(out), np.asarray(ref),
                             rtol=5e-2, atol=5e-2)
  print("KERNEL_OK")
</pallas_src>

<mosaic_0001>
module attributes {stable_mosaic.version = 11 : i64} {
  func.func @_cross_encoder_kernel(%arg0: i32, %arg1: memref<16x32xf32, #tpu.memory_space<vmem>>, %arg2: memref<32x32xf32, #tpu.memory_space<vmem>>, %arg3: memref<2x1x16xf32, #tpu.memory_space<vmem>>, %arg4: memref<32x32xbf16, #tpu.memory_space<vmem>>, %arg5: memref<1x32xf32, #tpu.memory_space<vmem>>, %arg6: memref<32x64xbf16, #tpu.memory_space<vmem>>, %arg7: memref<1x64xf32, #tpu.memory_space<vmem>>, %arg8: memref<32x32xbf16, #tpu.memory_space<vmem>>, %arg9: memref<1x32xf32, #tpu.memory_space<vmem>>, %arg10: memref<1x32xf32, #tpu.memory_space<vmem>>, %arg11: memref<1x32xf32, #tpu.memory_space<vmem>>, %arg12: memref<32x64xbf16, #tpu.memory_space<vmem>>, %arg13: memref<1x64xf32, #tpu.memory_space<vmem>>, %arg14: memref<64x32xbf16, #tpu.memory_space<vmem>>, %arg15: memref<1x32xf32, #tpu.memory_space<vmem>>, %arg16: memref<1x32xf32, #tpu.memory_space<vmem>>, %arg17: memref<1x32xf32, #tpu.memory_space<vmem>>, %arg18: memref<16x32xf32, #tpu.memory_space<vmem>>) attributes {dimension_semantics = [#tpu.dimension_semantics<parallel>], iteration_bounds = array<i64: 1>, scalar_prefetch = 0 : i64, scratch_operands = 0 : i64, tpu.core_type = #tpu.core_type<tc>, window_params = [{transform_indices = @transform_0, window_bounds = array<i64: 16, 32>}, {transform_indices = @transform_1, window_bounds = array<i64: 32, 32>}, {transform_indices = @transform_2, window_bounds = array<i64: 2, 1, 16>}, {pipeline_mode = #tpu.pipeline_mode<synchronous>, transform_indices = @transform_3, window_bounds = array<i64: 32, 32>}, {pipeline_mode = #tpu.pipeline_mode<synchronous>, transform_indices = @transform_4, window_bounds = array<i64: 1, 32>}, {pipeline_mode = #tpu.pipeline_mode<synchronous>, transform_indices = @transform_5, window_bounds = array<i64: 32, 64>}, {pipeline_mode = #tpu.pipeline_mode<synchronous>, transform_indices = @transform_6, window_bounds = array<i64: 1, 64>}, {pipeline_mode = #tpu.pipeline_mode<synchronous>, transform_indices = @transform_7, window_bounds = array<i64: 32, 32>}, {pipeline_mode = #tpu.pipeline_mode<synchronous>, transform_indices = @transform_8, window_bounds = array<i64: 1, 32>}, {pipeline_mode = #tpu.pipeline_mode<synchronous>, transform_indices = @transform_9, window_bounds = array<i64: 1, 32>}, {pipeline_mode = #tpu.pipeline_mode<synchronous>, transform_indices = @transform_10, window_bounds = array<i64: 1, 32>}, {pipeline_mode = #tpu.pipeline_mode<synchronous>, transform_indices = @transform_11, window_bounds = array<i64: 32, 64>}, {pipeline_mode = #tpu.pipeline_mode<synchronous>, transform_indices = @transform_12, window_bounds = array<i64: 1, 64>}, {pipeline_mode = #tpu.pipeline_mode<synchronous>, transform_indices = @transform_13, window_bounds = array<i64: 64, 32>}, {pipeline_mode = #tpu.pipeline_mode<synchronous>, transform_indices = @transform_14, window_bounds = array<i64: 1, 32>}, {pipeline_mode = #tpu.pipeline_mode<synchronous>, transform_indices = @transform_15, window_bounds = array<i64: 1, 32>}, {pipeline_mode = #tpu.pipeline_mode<synchronous>, transform_indices = @transform_16, window_bounds = array<i64: 1, 32>}, {transform_indices = @transform_17, window_bounds = array<i64: 16, 32>}]} {
    %c0 = arith.constant 0 : index
    %c0_0 = arith.constant 0 : index
    %0 = vector.load %arg1[%c0, %c0_0] : memref<16x32xf32, #tpu.memory_space<vmem>>, vector<16x32xf32>
    %1 = arith.truncf %0 : vector<16x32xf32> to vector<16x32xbf16>
    %c0_1 = arith.constant 0 : index
    %c0_2 = arith.constant 0 : index
    %2 = vector.load %arg2[%c0_1, %c0_2] : memref<32x32xf32, #tpu.memory_space<vmem>>, vector<32x32xf32>
    %3 = arith.truncf %2 : vector<32x32xf32> to vector<32x32xbf16>
    %c0_3 = arith.constant 0 : index
    %c0_4 = arith.constant 0 : index
    %4 = vector.load %arg4[%c0_3, %c0_4] : memref<32x32xbf16, #tpu.memory_space<vmem>>, vector<32x32xbf16>
    %cst = arith.constant dense<0.000000e+00> : vector<16x32xf32>
    %5 = tpu.matmul %1, %4, %cst {dimension_numbers = #tpu.dot_dimension_numbers<[1], [0], [0], [1], [0, 0, 1, 1], [], []>} : vector<16x32xbf16>, vector<32x32xbf16>, vector<16x32xf32> -> vector<16x32xf32>
    %c0_5 = arith.constant 0 : index
    %c0_6 = arith.constant 0 : index
    %6 = vector.load %arg5[%c0_5, %c0_6] : memref<1x32xf32, #tpu.memory_space<vmem>>, vector<1x32xf32>
    %7 = vector.broadcast %6 : vector<1x32xf32> to vector<16x32xf32>
    %8 = arith.addf %5, %7 : vector<16x32xf32>
    %c0_7 = arith.constant 0 : index
    %c0_8 = arith.constant 0 : index
    %9 = vector.load %arg6[%c0_7, %c0_8] : memref<32x64xbf16, #tpu.memory_space<vmem>>, vector<32x64xbf16>
    %cst_9 = arith.constant dense<0.000000e+00> : vector<32x64xf32>
    %10 = tpu.matmul %3, %9, %cst_9 {dimension_numbers = #tpu.dot_dimension_numbers<[1], [0], [0], [1], [0, 0, 1, 1], [], []>} : vector<32x32xbf16>, vector<32x64xbf16>, vector<32x64xf32> -> vector<32x64xf32>
    %c0_10 = arith.constant 0 : index
    %c0_11 = arith.constant 0 : index
    %11 = vector.load %arg7[%c0_10, %c0_11] : memref<1x64xf32, #tpu.memory_space<vmem>>, vector<1x64xf32>
    %12 = vector.broadcast %11 : vector<1x64xf32> to vector<32x64xf32>
    %13 = arith.addf %10, %12 : vector<32x64xf32>
    %14 = vector.shape_cast %8 : vector<16x32xf32> to vector<2x8x32xf32>
    %15 = arith.truncf %14 : vector<2x8x32xf32> to vector<2x8x32xbf16>
    %16 = vector.extract_strided_slice %13 {offsets = [0, 0], sizes = [32, 32], strides = [1, 1]} : vector<32x64xf32> to vector<32x32xf32>
    %17 = vector.shape_cast %16 : vector<32x32xf32> to vector<2x16x32xf32>
    %18 = arith.truncf %17 : vector<2x16x32xf32> to vector<2x16x32xbf16>
    %19 = vector.extract_strided_slice %13 {offsets = [0, 32], sizes = [32, 32], strides = [1, 1]} : vector<32x64xf32> to vector<32x32xf32>
    %20 = vector.shape_cast %19 : vector<32x32xf32> to vector<2x16x32xf32>
    %21 = arith.truncf %20 : vector<2x16x32xf32> to vector<2x16x32xbf16>
    %c0_12 = arith.constant 0 : index
    %c0_13 = arith.constant 0 : index
    %c0_14 = arith.constant 0 : index
    %22 = vector.load %arg3[%c0_12, %c0_13, %c0_14] : memref<2x1x16xf32, #tpu.memory_space<vmem>>, vector<2x1x16xf32>
    %cst_15 = arith.constant 0.000000e+00 : f32
    %23 = vector.broadcast %cst_15 : f32 to vector<2x1x16xf32>
    %24 = arith.cmpf oeq, %22, %23 : vector<2x1x16xf32>
    %cst_16 = arith.constant -1.000000e+09 : f32
    %cst_17 = arith.constant 0.000000e+00 : f32
    %25 = vector.broadcast %cst_16 : f32 to vector<2x1x16xf32>
    %26 = vector.broadcast %cst_17 : f32 to vector<2x1x16xf32>
    %27 = arith.select %24, %25, %26 : vector<2x1x16xi1>, vector<2x1x16xf32>
    %28 = vector.shape_cast %27 : vector<2x1x16xf32> to vector<2x1x16xf32>
    %29 = vector.broadcast %28 : vector<2x1x16xf32> to vector<2x8x16xf32>
    %c0_18 = arith.constant 0 : index
    %c0_19 = arith.constant 0 : index
    %30 = vector.load %arg8[%c0_18, %c0_19] : memref<32x32xbf16, #tpu.memory_space<vmem>>, vector<32x32xbf16>
    %cst_20 = arith.constant 0.000000e+00 : f32
    %31 = vector.broadcast %cst_20 : f32 to vector<16x32xf32>
    %32 = vector.extract_strided_slice %15 {offsets = [0, 0, 0], sizes = [2, 8, 8], strides = [1, 1, 1]} : vector<2x8x32xbf16> to vector<2x8x8xbf16>
    %33 = vector.extract_strided_slice %18 {offsets = [0, 0, 0], sizes = [2, 16, 8], strides = [1, 1, 1]} : vector<2x16x32xbf16> to vector<2x16x8xbf16>
    "tpu.trace_start"() <{level = 10 : i32, message = "bqd,bkd->bqk"}> : () -> ()
    %cst_21 = arith.constant dense<0.000000e+00> : vector<2x8x16xf32>
    %34 = tpu.matmul %32, %33, %cst_21 {dimension_numbers = #tpu.dot_dimension_numbers<[2], [2], [1], [1], [0, 0, 0, 1, 1, 1], [0], [0]>} : vector<2x8x8xbf16>, vector<2x16x8xbf16>, vector<2x8x16xf32> -> vector<2x8x16xf32>
    "tpu.trace_stop"() : () -> ()
    %35 = arith.addf %34, %29 : vector<2x8x16xf32>
    %cst_22 = arith.constant dense<0xFF800000> : vector<2x8xf32>
    %36 = vector.multi_reduction <maximumf>, %35, %cst_22 [2] : vector<2x8x16xf32> to vector<2x8xf32>
    %37 = vector.shape_cast %36 : vector<2x8xf32> to vector<2x8x1xf32>
    %38 = vector.broadcast %37 : vector<2x8x1xf32> to vector<2x8x16xf32>
    %39 = arith.subf %35, %38 : vector<2x8x16xf32>
    %40 = math.exp %39 : vector<2x8x16xf32>
    %cst_23 = arith.constant dense<0.000000e+00> : vector<2x8xf32>
    %41 = vector.multi_reduction <add>, %40, %cst_23 [2] : vector<2x8x16xf32> to vector<2x8xf32>
    %42 = vector.shape_cast %41 : vector<2x8xf32> to vector<2x8x1xf32>
    %43 = tpu.reciprocal %42 {approx = true} : vector<2x8x1xf32> -> vector<2x8x1xf32>
    %44 = vector.broadcast %43 : vector<2x8x1xf32> to vector<2x8x16xf32>
    %45 = arith.mulf %40, %44 : vector<2x8x16xf32>
    %46 = arith.truncf %45 : vector<2x8x16xf32> to vector<2x8x16xbf16>
    %47 = vector.extract_strided_slice %21 {offsets = [0, 0, 0], sizes = [2, 16, 8], strides = [1, 1, 1]} : vector<2x16x32xbf16> to vector<2x16x8xbf16>
    "tpu.trace_start"() <{level = 10 : i32, message = "bqk,bkd->bqd"}> : () -> ()
    %cst_24 = arith.constant dense<0.000000e+00> : vector<2x8x8xf32>
    %48 = tpu.matmul %46, %47, %cst_24 {dimension_numbers = #tpu.dot_dimension_numbers<[2], [1], [1], [2], [0, 0, 0, 1, 1, 2], [0], [0]>} : vector<2x8x16xbf16>, vector<2x16x8xbf16>, vector<2x8x8xf32> -> vector<2x8x8xf32>
    "tpu.trace_stop"() : () -> ()
    %49 = vector.shape_cast %48 : vector<2x8x8xf32> to vector<16x8xf32>
    %50 = arith.truncf %49 : vector<16x8xf32> to vector<16x8xbf16>
    %51 = vector.extract_strided_slice %30 {offsets = [0, 0], sizes = [8, 32], strides = [1, 1]} : vector<32x32xbf16> to vector<8x32xbf16>
    %cst_25 = arith.constant dense<0.000000e+00> : vector<16x32xf32>
    %52 = tpu.matmul %50, %51, %cst_25 {dimension_numbers = #tpu.dot_dimension_numbers<[1], [0], [0], [1], [0, 0, 1, 1], [], []>} : vector<16x8xbf16>, vector<8x32xbf16>, vector<16x32xf32> -> vector<16x32xf32>
    %53 = arith.addf %31, %52 : vector<16x32xf32>
    %54 = vector.extract_strided_slice %15 {offsets = [0, 0, 8], sizes = [2, 8, 8], strides = [1, 1, 1]} : vector<2x8x32xbf16> to vector<2x8x8xbf16>
    %55 = vector.extract_strided_slice %18 {offsets = [0, 0, 8], sizes = [2, 16, 8], strides = [1, 1, 1]} : vector<2x16x32xbf16> to vector<2x16x8xbf16>
    "tpu.trace_start"() <{level = 10 : i32, message = "bqd,bkd->bqk"}> : () -> ()
    %cst_26 = arith.constant dense<0.000000e+00> : vector<2x8x16xf32>
    %56 = tpu.matmul %54, %55, %cst_26 {dimension_numbers = #tpu.dot_dimension_numbers<[2], [2], [1], [1], [0, 0, 0, 1, 1, 1], [0], [0]>} : vector<2x8x8xbf16>, vector<2x16x8xbf16>, vector<2x8x16xf32> -> vector<2x8x16xf32>
    "tpu.trace_stop"() : () -> ()
    %57 = arith.addf %56, %29 : vector<2x8x16xf32>
    %cst_27 = arith.constant dense<0xFF800000> : vector<2x8xf32>
    %58 = vector.multi_reduction <maximumf>, %57, %cst_27 [2] : vector<2x8x16xf32> to vector<2x8xf32>
    %59 = vector.shape_cast %58 : vector<2x8xf32> to vector<2x8x1xf32>
    %60 = vector.broadcast %59 : vector<2x8x1xf32> to vector<2x8x16xf32>
    %61 = arith.subf %57, %60 : vector<2x8x16xf32>
    %62 = math.exp %61 : vector<2x8x16xf32>
    %cst_28 = arith.constant dense<0.000000e+00> : vector<2x8xf32>
    %63 = vector.multi_reduction <add>, %62, %cst_28 [2] : vector<2x8x16xf32> to vector<2x8xf32>
    %64 = vector.shape_cast %63 : vector<2x8xf32> to vector<2x8x1xf32>
    %65 = tpu.reciprocal %64 {approx = true} : vector<2x8x1xf32> -> vector<2x8x1xf32>
    %66 = vector.broadcast %65 : vector<2x8x1xf32> to vector<2x8x16xf32>
    %67 = arith.mulf %62, %66 : vector<2x8x16xf32>
    %68 = arith.truncf %67 : vector<2x8x16xf32> to vector<2x8x16xbf16>
    %69 = vector.extract_strided_slice %21 {offsets = [0, 0, 8], sizes = [2, 16, 8], strides = [1, 1, 1]} : vector<2x16x32xbf16> to vector<2x16x8xbf16>
    "tpu.trace_start"() <{level = 10 : i32, message = "bqk,bkd->bqd"}> : () -> ()
    %cst_29 = arith.constant dense<0.000000e+00> : vector<2x8x8xf32>
    %70 = tpu.matmul %68, %69, %cst_29 {dimension_numbers = #tpu.dot_dimension_numbers<[2], [1], [1], [2], [0, 0, 0, 1, 1, 2], [0], [0]>} : vector<2x8x16xbf16>, vector<2x16x8xbf16>, vector<2x8x8xf32> -> vector<2x8x8xf32>
    "tpu.trace_stop"() : () -> ()
    %71 = vector.shape_cast %70 : vector<2x8x8xf32> to vector<16x8xf32>
    %72 = arith.truncf %71 : vector<16x8xf32> to vector<16x8xbf16>
    %73 = vector.extract_strided_slice %30 {offsets = [8, 0], sizes = [8, 32], strides = [1, 1]} : vector<32x32xbf16> to vector<8x32xbf16>
    %cst_30 = arith.constant dense<0.000000e+00> : vector<16x32xf32>
    %74 = tpu.matmul %72, %73, %cst_30 {dimension_numbers = #tpu.dot_dimension_numbers<[1], [0], [0], [1], [0, 0, 1, 1], [], []>} : vector<16x8xbf16>, vector<8x32xbf16>, vector<16x32xf32> -> vector<16x32xf32>
    %75 = arith.addf %53, %74 : vector<16x32xf32>
    %76 = vector.extract_strided_slice %15 {offsets = [0, 0, 16], sizes = [2, 8, 8], strides = [1, 1, 1]} : vector<2x8x32xbf16> to vector<2x8x8xbf16>
    %77 = vector.extract_strided_slice %18 {offsets = [0, 0, 16], sizes = [2, 16, 8], strides = [1, 1, 1]} : vector<2x16x32xbf16> to vector<2x16x8xbf16>
    "tpu.trace_start"() <{level = 10 : i32, message = "bqd,bkd->bqk"}> : () -> ()
    %cst_31 = arith.constant dense<0.000000e+00> : vector<2x8x16xf32>
    %78 = tpu.matmul %76, %77, %cst_31 {dimension_numbers = #tpu.dot_dimension_numbers<[2], [2], [1], [1], [0, 0, 0, 1, 1, 1], [0], [0]>} : vector<2x8x8xbf16>, vector<2x16x8xbf16>, vector<2x8x16xf32> -> vector<2x8x16xf32>
    "tpu.trace_stop"() : () -> ()
    %79 = arith.addf %78, %29 : vector<2x8x16xf32>
    %cst_32 = arith.constant dense<0xFF800000> : vector<2x8xf32>
    %80 = vector.multi_reduction <maximumf>, %79, %cst_32 [2] : vector<2x8x16xf32> to vector<2x8xf32>
    %81 = vector.shape_cast %80 : vector<2x8xf32> to vector<2x8x1xf32>
    %82 = vector.broadcast %81 : vector<2x8x1xf32> to vector<2x8x16xf32>
    %83 = arith.subf %79, %82 : vector<2x8x16xf32>
    %84 = math.exp %83 : vector<2x8x16xf32>
    %cst_33 = arith.constant dense<0.000000e+00> : vector<2x8xf32>
    %85 = vector.multi_reduction <add>, %84, %cst_33 [2] : vector<2x8x16xf32> to vector<2x8xf32>
    %86 = vector.shape_cast %85 : vector<2x8xf32> to vector<2x8x1xf32>
    %87 = tpu.reciprocal %86 {approx = true} : vector<2x8x1xf32> -> vector<2x8x1xf32>
    %88 = vector.broadcast %87 : vector<2x8x1xf32> to vector<2x8x16xf32>
    %89 = arith.mulf %84, %88 : vector<2x8x16xf32>
    %90 = arith.truncf %89 : vector<2x8x16xf32> to vector<2x8x16xbf16>
    %91 = vector.extract_strided_slice %21 {offsets = [0, 0, 16], sizes = [2, 16, 8], strides = [1, 1, 1]} : vector<2x16x32xbf16> to vector<2x16x8xbf16>
    "tpu.trace_start"() <{level = 10 : i32, message = "bqk,bkd->bqd"}> : () -> ()
    %cst_34 = arith.constant dense<0.000000e+00> : vector<2x8x8xf32>
    %92 = tpu.matmul %90, %91, %cst_34 {dimension_numbers = #tpu.dot_dimension_numbers<[2], [1], [1], [2], [0, 0, 0, 1, 1, 2], [0], [0]>} : vector<2x8x16xbf16>, vector<2x16x8xbf16>, vector<2x8x8xf32> -> vector<2x8x8xf32>
    "tpu.trace_stop"() : () -> ()
    %93 = vector.shape_cast %92 : vector<2x8x8xf32> to vector<16x8xf32>
    %94 = arith.truncf %93 : vector<16x8xf32> to vector<16x8xbf16>
    %95 = vector.extract_strided_slice %30 {offsets = [16, 0], sizes = [8, 32], strides = [1, 1]} : vector<32x32xbf16> to vector<8x32xbf16>
    %cst_35 = arith.constant dense<0.000000e+00> : vector<16x32xf32>
    %96 = tpu.matmul %94, %95, %cst_35 {dimension_numbers = #tpu.dot_dimension_numbers<[1], [0], [0], [1], [0, 0, 1, 1], [], []>} : vector<16x8xbf16>, vector<8x32xbf16>, vector<16x32xf32> -> vector<16x32xf32>
    %97 = arith.addf %75, %96 : vector<16x32xf32>
    %98 = vector.extract_strided_slice %15 {offsets = [0, 0, 24], sizes = [2, 8, 8], strides = [1, 1, 1]} : vector<2x8x32xbf16> to vector<2x8x8xbf16>
    %99 = vector.extract_strided_slice %18 {offsets = [0, 0, 24], sizes = [2, 16, 8], strides = [1, 1, 1]} : vector<2x16x32xbf16> to vector<2x16x8xbf16>
    "tpu.trace_start"() <{level = 10 : i32, message = "bqd,bkd->bqk"}> : () -> ()
    %cst_36 = arith.constant dense<0.000000e+00> : vector<2x8x16xf32>
    %100 = tpu.matmul %98, %99, %cst_36 {dimension_numbers = #tpu.dot_dimension_numbers<[2], [2], [1], [1], [0, 0, 0, 1, 1, 1], [0], [0]>} : vector<2x8x8xbf16>, vector<2x16x8xbf16>, vector<2x8x16xf32> -> vector<2x8x16xf32>
    "tpu.trace_stop"() : () -> ()
    %101 = arith.addf %100, %29 : vector<2x8x16xf32>
    %cst_37 = arith.constant dense<0xFF800000> : vector<2x8xf32>
    %102 = vector.multi_reduction <maximumf>, %101, %cst_37 [2] : vector<2x8x16xf32> to vector<2x8xf32>
    %103 = vector.shape_cast %102 : vector<2x8xf32> to vector<2x8x1xf32>
    %104 = vector.broadcast %103 : vector<2x8x1xf32> to vector<2x8x16xf32>
    %105 = arith.subf %101, %104 : vector<2x8x16xf32>
    %106 = math.exp %105 : vector<2x8x16xf32>
    %cst_38 = arith.constant dense<0.000000e+00> : vector<2x8xf32>
    %107 = vector.multi_reduction <add>, %106, %cst_38 [2] : vector<2x8x16xf32> to vector<2x8xf32>
    %108 = vector.shape_cast %107 : vector<2x8xf32> to vector<2x8x1xf32>
    %109 = tpu.reciprocal %108 {approx = true} : vector<2x8x1xf32> -> vector<2x8x1xf32>
    %110 = vector.broadcast %109 : vector<2x8x1xf32> to vector<2x8x16xf32>
    %111 = arith.mulf %106, %110 : vector<2x8x16xf32>
    %112 = arith.truncf %111 : vector<2x8x16xf32> to vector<2x8x16xbf16>
    %113 = vector.extract_strided_slice %21 {offsets = [0, 0, 24], sizes = [2, 16, 8], strides = [1, 1, 1]} : vector<2x16x32xbf16> to vector<2x16x8xbf16>
    "tpu.trace_start"() <{level = 10 : i32, message = "bqk,bkd->bqd"}> : () -> ()
    %cst_39 = arith.constant dense<0.000000e+00> : vector<2x8x8xf32>
    %114 = tpu.matmul %112, %113, %cst_39 {dimension_numbers = #tpu.dot_dimension_numbers<[2], [1], [1], [2], [0, 0, 0, 1, 1, 2], [0], [0]>} : vector<2x8x16xbf16>, vector<2x16x8xbf16>, vector<2x8x8xf32> -> vector<2x8x8xf32>
    "tpu.trace_stop"() : () -> ()
    %115 = vector.shape_cast %114 : vector<2x8x8xf32> to vector<16x8xf32>
    %116 = arith.truncf %115 : vector<16x8xf32> to vector<16x8xbf16>
    %117 = vector.extract_strided_slice %30 {offsets = [24, 0], sizes = [8, 32], strides = [1, 1]} : vector<32x32xbf16> to vector<8x32xbf16>
    %cst_40 = arith.constant dense<0.000000e+00> : vector<16x32xf32>
    %118 = tpu.matmul %116, %117, %cst_40 {dimension_numbers = #tpu.dot_dimension_numbers<[1], [0], [0], [1], [0, 0, 1, 1], [], []>} : vector<16x8xbf16>, vector<8x32xbf16>, vector<16x32xf32> -> vector<16x32xf32>
    %119 = arith.addf %97, %118 : vector<16x32xf32>
    %c0_41 = arith.constant 0 : index
    %c0_42 = arith.constant 0 : index
    %120 = vector.load %arg9[%c0_41, %c0_42] : memref<1x32xf32, #tpu.memory_space<vmem>>, vector<1x32xf32>
    %121 = vector.broadcast %120 : vector<1x32xf32> to vector<16x32xf32>
    %122 = arith.addf %119, %121 : vector<16x32xf32>
    %123 = arith.addf %0, %122 : vector<16x32xf32>
    %c0_43 = arith.constant 0 : index
    %c0_44 = arith.constant 0 : index
    %124 = vector.load %arg10[%c0_43, %c0_44] : memref<1x32xf32, #tpu.memory_space<vmem>>, vector<1x32xf32>
    %c0_45 = arith.constant 0 : index
    %c0_46 = arith.constant 0 : index
    %125 = vector.load %arg11[%c0_45, %c0_46] : memref<1x32xf32, #tpu.memory_space<vmem>>, vector<1x32xf32>
    %cst_47 = arith.constant dense<0.000000e+00> : vector<16xf32>
    %126 = vector.multi_reduction <add>, %123, %cst_47 [1] : vector<16x32xf32> to vector<16xf32>
    %127 = vector.shape_cast %126 : vector<16xf32> to vector<16x1xf32>
    %cst_48 = arith.constant 3.200000e+01 : f32
    %128 = vector.broadcast %cst_48 : f32 to vector<16x1xf32>
    %129 = arith.divf %127, %128 : vector<16x1xf32>
    %130 = vector.broadcast %129 : vector<16x1xf32> to vector<16x32xf32>
    %131 = arith.subf %123, %130 : vector<16x32xf32>
    %132 = arith.mulf %131, %131 : vector<16x32xf32>
    %cst_49 = arith.constant dense<0.000000e+00> : vector<16xf32>
    %133 = vector.multi_reduction <add>, %132, %cst_49 [1] : vector<16x32xf32> to vector<16xf32>
    %134 = vector.shape_cast %133 : vector<16xf32> to vector<16x1xf32>
    %cst_50 = arith.constant 0.0322580636 : f32
    %135 = vector.broadcast %cst_50 : f32 to vector<16x1xf32>
    %136 = arith.mulf %134, %135 : vector<16x1xf32>
    %137 = math.sqrt %136 : vector<16x1xf32>
    %cst_51 = arith.constant 9.99999997E-7 : f32
    %138 = vector.broadcast %cst_51 : f32 to vector<16x1xf32>
    %139 = arith.addf %137, %138 : vector<16x1xf32>
    %140 = tpu.reciprocal %139 {approx = true} : vector<16x1xf32> -> vector<16x1xf32>
    %141 = vector.broadcast %124 : vector<1x32xf32> to vector<16x32xf32>
    %142 = arith.mulf %141, %131 : vector<16x32xf32>
    %143 = vector.broadcast %140 : vector<16x1xf32> to vector<16x32xf32>
    %144 = arith.mulf %142, %143 : vector<16x32xf32>
    %145 = vector.broadcast %125 : vector<1x32xf32> to vector<16x32xf32>
    %146 = arith.addf %144, %145 : vector<16x32xf32>
    %147 = arith.truncf %146 : vector<16x32xf32> to vector<16x32xbf16>
    %c0_52 = arith.constant 0 : index
    %c0_53 = arith.constant 0 : index
    %148 = vector.load %arg12[%c0_52, %c0_53] : memref<32x64xbf16, #tpu.memory_space<vmem>>, vector<32x64xbf16>
    %cst_54 = arith.constant dense<0.000000e+00> : vector<16x64xf32>
    %149 = tpu.matmul %147, %148, %cst_54 {dimension_numbers = #tpu.dot_dimension_numbers<[1], [0], [0], [1], [0, 0, 1, 1], [], []>} : vector<16x32xbf16>, vector<32x64xbf16>, vector<16x64xf32> -> vector<16x64xf32>
    %c0_55 = arith.constant 0 : index
    %c0_56 = arith.constant 0 : index
    %150 = vector.load %arg13[%c0_55, %c0_56] : memref<1x64xf32, #tpu.memory_space<vmem>>, vector<1x64xf32>
    %151 = vector.broadcast %150 : vector<1x64xf32> to vector<16x64xf32>
    %152 = arith.addf %149, %151 : vector<16x64xf32>
    %cst_57 = arith.constant 0.000000e+00 : f32
    %153 = vector.broadcast %cst_57 : f32 to vector<16x64xf32>
    %154 = arith.maximumf %152, %153 : vector<16x64xf32>
    %155 = arith.truncf %154 : vector<16x64xf32> to vector<16x64xbf16>
    %c0_58 = arith.constant 0 : index
    %c0_59 = arith.constant 0 : index
    %156 = vector.load %arg14[%c0_58, %c0_59] : memref<64x32xbf16, #tpu.memory_space<vmem>>, vector<64x32xbf16>
    %cst_60 = arith.constant dense<0.000000e+00> : vector<16x32xf32>
    %157 = tpu.matmul %155, %156, %cst_60 {dimension_numbers = #tpu.dot_dimension_numbers<[1], [0], [0], [1], [0, 0, 1, 1], [], []>} : vector<16x64xbf16>, vector<64x32xbf16>, vector<16x32xf32> -> vector<16x32xf32>
    %c0_61 = arith.constant 0 : index
    %c0_62 = arith.constant 0 : index
    %158 = vector.load %arg15[%c0_61, %c0_62] : memref<1x32xf32, #tpu.memory_space<vmem>>, vector<1x32xf32>
    %159 = vector.broadcast %158 : vector<1x32xf32> to vector<16x32xf32>
    %160 = arith.addf %157, %159 : vector<16x32xf32>
    %161 = arith.addf %146, %160 : vector<16x32xf32>
    %c0_63 = arith.constant 0 : index
    %c0_64 = arith.constant 0 : index
    %162 = vector.load %arg16[%c0_63, %c0_64] : memref<1x32xf32, #tpu.memory_space<vmem>>, vector<1x32xf32>
    %c0_65 = arith.constant 0 : index
    %c0_66 = arith.constant 0 : index
    %163 = vector.load %arg17[%c0_65, %c0_66] : memref<1x32xf32, #tpu.memory_space<vmem>>, vector<1x32xf32>
    %cst_67 = arith.constant dense<0.000000e+00> : vector<16xf32>
    %164 = vector.multi_reduction <add>, %161, %cst_67 [1] : vector<16x32xf32> to vector<16xf32>
    %165 = vector.shape_cast %164 : vector<16xf32> to vector<16x1xf32>
    %cst_68 = arith.constant 3.200000e+01 : f32
    %166 = vector.broadcast %cst_68 : f32 to vector<16x1xf32>
    %167 = arith.divf %165, %166 : vector<16x1xf32>
    %168 = vector.broadcast %167 : vector<16x1xf32> to vector<16x32xf32>
    %169 = arith.subf %161, %168 : vector<16x32xf32>
    %170 = arith.mulf %169, %169 : vector<16x32xf32>
    %cst_69 = arith.constant dense<0.000000e+00> : vector<16xf32>
    %171 = vector.multi_reduction <add>, %170, %cst_69 [1] : vector<16x32xf32> to vector<16xf32>
    %172 = vector.shape_cast %171 : vector<16xf32> to vector<16x1xf32>
    %cst_70 = arith.constant 0.0322580636 : f32
    %173 = vector.broadcast %cst_70 : f32 to vector<16x1xf32>
    %174 = arith.mulf %172, %173 : vector<16x1xf32>
    %175 = math.sqrt %174 : vector<16x1xf32>
    %cst_71 = arith.constant 9.99999997E-7 : f32
    %176 = vector.broadcast %cst_71 : f32 to vector<16x1xf32>
    %177 = arith.addf %175, %176 : vector<16x1xf32>
    %178 = tpu.reciprocal %177 {approx = true} : vector<16x1xf32> -> vector<16x1xf32>
    %179 = vector.broadcast %162 : vector<1x32xf32> to vector<16x32xf32>
    %180 = arith.mulf %179, %169 : vector<16x32xf32>
    %181 = vector.broadcast %178 : vector<16x1xf32> to vector<16x32xf32>
    %182 = arith.mulf %180, %181 : vector<16x32xf32>
    %183 = vector.broadcast %163 : vector<1x32xf32> to vector<16x32xf32>
    %184 = arith.addf %182, %183 : vector<16x32xf32>
    %c0_72 = arith.constant 0 : index
    %c0_73 = arith.constant 0 : index
    %185 = vector.load %arg18[%c0_72, %c0_73] : memref<16x32xf32, #tpu.memory_space<vmem>>, vector<16x32xf32>
    tpu.vector_store %arg18[%c0_72, %c0_73], %184 {strides = array<i32>} : memref<16x32xf32, #tpu.memory_space<vmem>>, vector<16x32xf32>,
    return
  }
  func.func @transform_0(%arg0: i32) -> (i32, i32) {
    %c0_i32 = arith.constant 0 : i32
    %c0_i32_0 = arith.constant 0 : i32
    return %arg0, %c0_i32 : i32, i32
  }
  func.func @transform_1(%arg0: i32) -> (i32, i32) {
    %c0_i32 = arith.constant 0 : i32
    %c0_i32_0 = arith.constant 0 : i32
    return %arg0, %c0_i32 : i32, i32
  }
  func.func @transform_2(%arg0: i32) -> (i32, i32, i32) {
    %c0_i32 = arith.constant 0 : i32
    %c0_i32_0 = arith.constant 0 : i32
    %c0_i32_1 = arith.constant 0 : i32
    return %arg0, %c0_i32, %c0_i32_0 : i32, i32, i32
  }
  func.func @transform_3(%arg0: i32) -> (i32, i32) {
    %c0_i32 = arith.constant 0 : i32
    %c0_i32_0 = arith.constant 0 : i32
    %c0_i32_1 = arith.constant 0 : i32
    return %c0_i32, %c0_i32_0 : i32, i32
  }
  func.func @transform_4(%arg0: i32) -> (i32, i32) {
    %c0_i32 = arith.constant 0 : i32
    %c0_i32_0 = arith.constant 0 : i32
    %c0_i32_1 = arith.constant 0 : i32
    return %c0_i32, %c0_i32_0 : i32, i32
  }
  func.func @transform_5(%arg0: i32) -> (i32, i32) {
    %c0_i32 = arith.constant 0 : i32
    %c0_i32_0 = arith.constant 0 : i32
    %c0_i32_1 = arith.constant 0 : i32
    return %c0_i32, %c0_i32_0 : i32, i32
  }
  func.func @transform_6(%arg0: i32) -> (i32, i32) {
    %c0_i32 = arith.constant 0 : i32
    %c0_i32_0 = arith.constant 0 : i32
    %c0_i32_1 = arith.constant 0 : i32
    return %c0_i32, %c0_i32_0 : i32, i32
  }
  func.func @transform_7(%arg0: i32) -> (i32, i32) {
    %c0_i32 = arith.constant 0 : i32
    %c0_i32_0 = arith.constant 0 : i32
    %c0_i32_1 = arith.constant 0 : i32
    return %c0_i32, %c0_i32_0 : i32, i32
  }
  func.func @transform_8(%arg0: i32) -> (i32, i32) {
    %c0_i32 = arith.constant 0 : i32
    %c0_i32_0 = arith.constant 0 : i32
    %c0_i32_1 = arith.constant 0 : i32
    return %c0_i32, %c0_i32_0 : i32, i32
  }
  func.func @transform_9(%arg0: i32) -> (i32, i32) {
    %c0_i32 = arith.constant 0 : i32
    %c0_i32_0 = arith.constant 0 : i32
    %c0_i32_1 = arith.constant 0 : i32
    return %c0_i32, %c0_i32_0 : i32, i32
  }
  func.func @transform_10(%arg0: i32) -> (i32, i32) {
    %c0_i32 = arith.constant 0 : i32
    %c0_i32_0 = arith.constant 0 : i32
    %c0_i32_1 = arith.constant 0 : i32
    return %c0_i32, %c0_i32_0 : i32, i32
  }
  func.func @transform_11(%arg0: i32) -> (i32, i32) {
    %c0_i32 = arith.constant 0 : i32
    %c0_i32_0 = arith.constant 0 : i32
    %c0_i32_1 = arith.constant 0 : i32
    return %c0_i32, %c0_i32_0 : i32, i32
  }
  func.func @transform_12(%arg0: i32) -> (i32, i32) {
    %c0_i32 = arith.constant 0 : i32
    %c0_i32_0 = arith.constant 0 : i32
    %c0_i32_1 = arith.constant 0 : i32
    return %c0_i32, %c0_i32_0 : i32, i32
  }
  func.func @transform_13(%arg0: i32) -> (i32, i32) {
    %c0_i32 = arith.constant 0 : i32
    %c0_i32_0 = arith.constant 0 : i32
    %c0_i32_1 = arith.constant 0 : i32
    return %c0_i32, %c0_i32_0 : i32, i32
  }
  func.func @transform_14(%arg0: i32) -> (i32, i32) {
    %c0_i32 = arith.constant 0 : i32
    %c0_i32_0 = arith.constant 0 : i32
    %c0_i32_1 = arith.constant 0 : i32
    return %c0_i32, %c0_i32_0 : i32, i32
  }
  func.func @transform_15(%arg0: i32) -> (i32, i32) {
    %c0_i32 = arith.constant 0 : i32
    %c0_i32_0 = arith.constant 0 : i32
    %c0_i32_1 = arith.constant 0 : i32
    return %c0_i32, %c0_i32_0 : i32, i32
  }
  func.func @transform_16(%arg0: i32) -> (i32, i32) {
    %c0_i32 = arith.constant 0 : i32
    %c0_i32_0 = arith.constant 0 : i32
    %c0_i32_1 = arith.constant 0 : i32
    return %c0_i32, %c0_i32_0 : i32, i32
  }
  func.func @transform_17(%arg0: i32) -> (i32, i32) {
    %c0_i32 = arith.constant 0 : i32
    %c0_i32_0 = arith.constant 0 : i32
    return %arg0, %c0_i32 : i32, i32
  }
}

</mosaic_0001>

<bundles_post_ra>
// kernel: tpu_custom_call.1
= control target key start
LH: loop header
LB: loop body
LE: loop exit
PB: predicated region body
PF: predicated region fallthrough
CT: control target
= control target key end

     0   :  { %s3192_s0 = inlined_call_operand.hbm [shape: f32[16,32], index: 0, kind: input, shape index: {}]   ;;  %s3193_s1 = inlined_call_operand.hbm [shape: f32[32,32], index: 1, kind: input, shape index: {}]   ;;  %s3194_s2 = inlined_call_operand.hbm [shape: f32[2,1,16], index: 2, kind: input, shape index: {}]   ;;  %s3195_s3 = inlined_call_operand.hbm [shape: bf16[32,32], index: 3, kind: input, shape index: {}]   ;;  %s3196_s4 = inlined_call_operand.hbm [shape: f32[1,32], index: 4, kind: input, shape index: {}]   ;;  %s3197_s5 = inlined_call_operand.hbm [shape: bf16[32,64], index: 5, kind: input, shape index: {}]   ;;  %s3198_s6 = inlined_call_operand.hbm [shape: f32[1,64], index: 6, kind: input, shape index: {}]   ;;  %s3199_s7 = inlined_call_operand.hbm [shape: bf16[32,32], index: 7, kind: input, shape index: {}]   ;;  %s3200_s8 = inlined_call_operand.hbm [shape: f32[1,32], index: 8, kind: input, shape index: {}]   ;;  %s3201_s9 = inlined_call_operand.hbm [shape: f32[1,32], index: 9, kind: input, shape index: {}]   ;;  %s3202_s10 = inlined_call_operand.hbm [shape: f32[1,32], index: 10, kind: input, shape index: {}]   ;;  %s3203_s11 = inlined_call_operand.hbm [shape: bf16[32,64], index: 11, kind: input, shape index: {}]   ;;  %s3204_s12 = inlined_call_operand.hbm [shape: f32[1,64], index: 12, kind: input, shape index: {}]   ;;  %s3205_s13 = inlined_call_operand.hbm [shape: bf16[64,32], index: 13, kind: input, shape index: {}]   ;;  %s3206_s14 = inlined_call_operand.hbm [shape: f32[1,32], index: 14, kind: input, shape index: {}]   ;;  %s3207_s15 = inlined_call_operand.hbm [shape: f32[1,32], index: 15, kind: input, shape index: {}]   ;;  %s3208_s16 = inlined_call_operand.hbm [shape: f32[1,32], index: 16, kind: input, shape index: {}]   ;;  %s3209_s17 = inlined_call_operand.hbm [shape: f32[16,32], index: 17, kind: output, shape index: {}]  }
   0x1   :  { %3217 = sst [smem:[#allocation40_spill]] %s3192_s0 }
   0x2   :  { %3218 = sst [smem:[#allocation41_spill]] %s3193_s1 }
   0x3   :  { %3219 = sst [smem:[#allocation42_spill]] %s3209_s17 }
   0x4   :  { %22 = vsyncpa [#allocation3], 0 }
   0x5   :  { %23 = vsyncpa [#allocation6], 0 }
   0x6   :  { %24 = vsyncpa [#allocation9], 0 }
   0x7   :  { %25 = vsyncpa [#allocation12], 0 }
   0x8   :  { %26 = vsyncpa [#allocation15], 0 }
   0x9   :  { %27 = vsyncpa [#allocation18], 0 }
   0xa   :  { %28 = vsyncpa [#allocation21], 0 }
   0xb   :  { %29 = vsyncpa [#allocation24], 0 }
   0xc   :  { %30 = vsyncpa [#allocation27], 0 }
   0xd   :  { %31 = vsyncpa [#allocation4], 0  ;;  %s2584_s24 = smov [#allocation5]   ;;  %s2585_s26 = smov [#allocation8]  }
   0xe   :  { %s49_s25 = sshll.u32 %s2584_s24, 4  ;;  %s73_s27 = sshll.u32 %s2585_s26, 4  ;;  %s50_s25 = int_to_ptr.vmem [resolvable:$true] %s49_s25  ;;  %s2707_s27 = int_to_ptr.vmem [resolvable:$true] %s73_s27 }
   0xf   :  { %s3220_s0 = sld [smem:[#allocation41_spill]] }
  0x15   :  { %s2168_s30 = scalar_lea.hbm %s3220_s0, 512 }
  0x16   :  { %p2169_p0 = scmp.ne.s32.totalorder %s3220_s0, %s2168_s30  ;;  %p2172_p1 = scmp.lt.u32.totalorder %s2168_s30, %s3220_s0 }
  0x18   :  { %p2174_p2 = pnand %p2172_p1, %p2169_p0 }
  0x1a   :  { %2177 = shalt.err (!%p2174_p2)
}
  0x1b   :  { %s2178_s21 = scalar_lea.vmem %s50_s25, 512  ;;  %p2183_p4 = scmp.lt.s32.totalorder %s50_s25, %s50_s25 }
  0x1c   :  { %p2179_p3 = scmp.ne.s32.totalorder %s50_s25, %s2178_s21  ;;  %p2184_p5 = scmp.lt.s32.totalorder %s2178_s21, %s2178_s21 }
  0x1e   :  { %p2185_p6 = por %p2184_p5, %p2183_p4 }
  0x20   :  { %p2186_p7 = pnand %p2185_p6, %p2179_p3 }
  0x22   :  { %2189 = shalt.err (!%p2186_p7)
}
  0x23   :  { %s3212_s22 = smov 128   ;;  %s3214_s23 = smov 8  }
  0x24   :  { %55 = dma.hbm_to_vmem [thread:$0]  %s3220_s0, 512, %s50_s25, [#allocation6], %s3212_s22, %s3212_s22, %s3214_s23  }
  0x25   :  { %s2190_s30 = scalar_lea.hbm %s3195_s3, 256 }
  0x26   :  { %p2191_p8 = scmp.ne.s32.totalorder %s3195_s3, %s2190_s30  ;;  %p2194_p9 = scmp.lt.u32.totalorder %s2190_s30, %s3195_s3 }
  0x28   :  { %p2196_p10 = pnand %p2194_p9, %p2191_p8 }
  0x2a   :  { %2199 = shalt.err (!%p2196_p10)
}
  0x2b   :  { %s2200_s21 = scalar_lea.vmem %s2707_s27, 256  ;;  %p2205_p12 = scmp.lt.s32.totalorder %s2707_s27, %s2707_s27 }
  0x2c   :  { %p2201_p11 = scmp.ne.s32.totalorder %s2707_s27, %s2200_s21  ;;  %p2206_p13 = scmp.lt.s32.totalorder %s2200_s21, %s2200_s21 }
  0x2e   :  { %p2207_p0 = por %p2206_p13, %p2205_p12 }
  0x30   :  { %p2208_p1 = pnand %p2207_p0, %p2201_p11 }
  0x32   :  { %2211 = shalt.err (!%p2208_p1)
}
  0x33   :  { %s2588_s25 = smov 64   ;;  %s2589_s0 = smov 4  }
  0x34   :  { %79 = dma.hbm_to_vmem [thread:$0]  %s3195_s3, 256, %s2707_s27, [#allocation9], %s2588_s25, %s2588_s25, %s2589_s0  }
  0x35   :  { %s2590_s28 = smov [#allocation11]   ;;  %s2591_s30 = smov [#allocation14]  }
  0x36   :  { %s95_s29 = sshll.u32 %s2590_s28, 4  ;;  %s117_s18 = sshll.u32 %s2591_s30, 4  ;;  %s96_s29 = int_to_ptr.vmem [resolvable:$true] %s95_s29  ;;  %s2744_s18 = int_to_ptr.vmem [resolvable:$true] %s117_s18 }
  0x37   :  { %s2212_s20 = scalar_lea.hbm %s3197_s5, 256 }
  0x38   :  { %p2213_p2 = scmp.ne.s32.totalorder %s3197_s5, %s2212_s20  ;;  %p2216_p3 = scmp.lt.u32.totalorder %s2212_s20, %s3197_s5 }
  0x3a   :  { %p2218_p4 = pnand %p2216_p3, %p2213_p2 }
  0x3c   :  { %2221 = shalt.err (!%p2218_p4)
}
  0x3d   :  { %s2222_s3 = scalar_lea.vmem %s96_s29, 256  ;;  %p2227_p6 = scmp.lt.s32.totalorder %s96_s29, %s96_s29 }
  0x3e   :  { %p2223_p5 = scmp.ne.s32.totalorder %s96_s29, %s2222_s3  ;;  %p2228_p7 = scmp.lt.s32.totalorder %s2222_s3, %s2222_s3 }
  0x40   :  { %p2229_p8 = por %p2228_p7, %p2227_p6 }
  0x42   :  { %p2230_p9 = pnand %p2229_p8, %p2223_p5 }
  0x44   :  { %2233 = shalt.err (!%p2230_p9)
}
  0x45   :  { %101 = dma.hbm_to_vmem [thread:$0]  %s3197_s5, 256, %s96_s29, [#allocation12], %s2588_s25, %s2588_s25, %s2589_s0  }
  0x46   :  { %s2234_s17 = scalar_lea.hbm %s3199_s7, 256 }
  0x47   :  { %p2235_p10 = scmp.ne.s32.totalorder %s3199_s7, %s2234_s17  ;;  %p2238_p11 = scmp.lt.u32.totalorder %s2234_s17, %s3199_s7 }
  0x49   :  { %p2240_p12 = pnand %p2238_p11, %p2235_p10 }
  0x4b   :  { %2243 = shalt.err (!%p2240_p12)
}
  0x4c   :  { %s2244_s1 = scalar_lea.vmem %s2744_s18, 256  ;;  %p2249_p0 = scmp.lt.s32.totalorder %s2744_s18, %s2744_s18 }
  0x4d   :  { %p2245_p13 = scmp.ne.s32.totalorder %s2744_s18, %s2244_s1  ;;  %p2250_p1 = scmp.lt.s32.totalorder %s2244_s1, %s2244_s1 }
  0x4f   :  { %p2251_p2 = por %p2250_p1, %p2249_p0 }
  0x51   :  { %p2252_p3 = pnand %p2251_p2, %p2245_p13 }
  0x53   :  { %2255 = shalt.err (!%p2252_p3)
}
  0x54   :  { %123 = dma.hbm_to_vmem [thread:$0]  %s3199_s7, 256, %s2744_s18, [#allocation15], %s2588_s25, %s2588_s25, %s2589_s0  }
  0x55   :  { %s2592_s20 = smov [#allocation17]   ;;  %s2593_s3 = smov [#allocation20]  }
  0x56   :  { %s140_s21 = sshll.u32 %s2592_s20, 4  ;;  %s159_s27 = sshll.u32 %s2593_s3, 4  ;;  %s141_s21 = int_to_ptr.vmem [resolvable:$true] %s140_s21  ;;  %s2781_s27 = int_to_ptr.vmem [resolvable:$true] %s159_s27 }
  0x57   :  { %s2256_s26 = scalar_lea.hbm %s3201_s9, 16 }
  0x58   :  { %p2257_p4 = scmp.ne.s32.totalorder %s3201_s9, %s2256_s26  ;;  %p2260_p5 = scmp.lt.u32.totalorder %s2256_s26, %s3201_s9 }
  0x5a   :  { %p2262_p6 = pnand %p2260_p5, %p2257_p4 }
  0x5c   :  { %2265 = shalt.err (!%p2262_p6)
}
  0x5d   :  { %s2266_s7 = scalar_lea.vmem %s141_s21, 16  ;;  %s2270_s18 = scalar_lea.vmem %s141_s21, 32 }
  0x5e   :  { %p2267_p7 = scmp.ne.s32.totalorder %s141_s21, %s2266_s7  ;;  %p2271_p8 = scmp.lt.s32.totalorder %s141_s21, %s141_s21 }
  0x5f   :  { %p2272_p9 = scmp.lt.s32.totalorder %s2270_s18, %s2266_s7 }
  0x61   :  { %p2273_p10 = por %p2272_p9, %p2271_p8 }
  0x63   :  { %p2274_p11 = pnand %p2273_p10, %p2267_p7 }
  0x65   :  { %2277 = shalt.err (!%p2274_p11)
}
  0x66   :  { %143 = dma.hbm_to_vmem [thread:$0]  %s3201_s9, 16, %s141_s21, [#allocation18]  }
  0x67   :  { %s2278_s20 = scalar_lea.hbm %s3203_s11, 256 }
  0x68   :  { %p2279_p12 = scmp.ne.s32.totalorder %s3203_s11, %s2278_s20  ;;  %p2282_p13 = scmp.lt.u32.totalorder %s2278_s20, %s3203_s11 }
  0x6a   :  { %p2284_p0 = pnand %p2282_p13, %p2279_p12 }
  0x6c   :  { %2287 = shalt.err (!%p2284_p0)
}
  0x6d   :  { %s2288_s17 = scalar_lea.vmem %s2781_s27, 256  ;;  %p2293_p2 = scmp.lt.s32.totalorder %s2781_s27, %s2781_s27 }
  0x6e   :  { %p2289_p1 = scmp.ne.s32.totalorder %s2781_s27, %s2288_s17  ;;  %p2294_p3 = scmp.lt.s32.totalorder %s2288_s17, %s2288_s17 }
  0x70   :  { %p2295_p4 = por %p2294_p3, %p2293_p2 }
  0x72   :  { %p2296_p5 = pnand %p2295_p4, %p2289_p1 }
  0x74   :  { %2299 = shalt.err (!%p2296_p5)
}
  0x75   :  { %165 = dma.hbm_to_vmem [thread:$0]  %s3203_s11, 256, %s2781_s27, [#allocation21], %s2588_s25, %s2588_s25, %s2589_s0  }
  0x76   :  { %s2594_s23 = smov [#allocation23]   ;;  %s2595_s30 = smov [#allocation26]  }
  0x77   :  { %s181_s28 = sshll.u32 %s2594_s23, 4  ;;  %s204_s7 = sshll.u32 %s2595_s30, 4  ;;  %s182_s28 = int_to_ptr.vmem [resolvable:$true] %s181_s28  ;;  %s205_s7 = int_to_ptr.vmem [resolvable:$true] %s204_s7 }
  0x78   :  { %s2300_s1 = scalar_lea.hbm %s3205_s13, 512 }
  0x79   :  { %p2301_p6 = scmp.ne.s32.totalorder %s3205_s13, %s2300_s1  ;;  %p2304_p7 = scmp.lt.u32.totalorder %s2300_s1, %s3205_s13 }
  0x7b   :  { %p2306_p8 = pnand %p2304_p7, %p2301_p6 }
  0x7d   :  { %2309 = shalt.err (!%p2306_p8)
}
  0x7e   :  { %s2310_s11 = scalar_lea.vmem %s182_s28, 512  ;;  %p2315_p10 = scmp.lt.s32.totalorder %s182_s28, %s182_s28 }
  0x7f   :  { %p2311_p9 = scmp.ne.s32.totalorder %s182_s28, %s2310_s11  ;;  %p2316_p11 = scmp.lt.s32.totalorder %s2310_s11, %s2310_s11 }
  0x81   :  { %p2317_p12 = por %p2316_p11, %p2315_p10 }
  0x83   :  { %p2318_p13 = pnand %p2317_p12, %p2311_p9 }
  0x85   :  { %2321 = shalt.err (!%p2318_p13)
}
  0x86   :  { %187 = dma.hbm_to_vmem [thread:$0]  %s3205_s13, 512, %s182_s28, [#allocation24], %s2588_s25, %s2588_s25, %s2589_s0  }
  0x87   :  { %s2322_s17 = scalar_lea.hbm %s3207_s15, 16 }
  0x88   :  { %p2323_p0 = scmp.ne.s32.totalorder %s3207_s15, %s2322_s17  ;;  %p2326_p1 = scmp.lt.u32.totalorder %s2322_s17, %s3207_s15 }
  0x8a   :  { %p2328_p2 = pnand %p2326_p1, %p2323_p0 }
  0x8c   :  { %2331 = shalt.err (!%p2328_p2)
}
  0x8d   :  { %s2332_s18 = scalar_lea.vmem %s205_s7, 16  ;;  %s2336_s19 = scalar_lea.vmem %s205_s7, 32 }
  0x8e   :  { %p2333_p3 = scmp.ne.s32.totalorder %s205_s7, %s2332_s18  ;;  %p2337_p4 = scmp.lt.s32.totalorder %s205_s7, %s205_s7 }
  0x8f   :  { %p2338_p5 = scmp.lt.s32.totalorder %s2336_s19, %s2332_s18 }
  0x91   :  { %p2339_p6 = por %p2338_p5, %p2337_p4 }
  0x93   :  { %p2340_p7 = pnand %p2339_p6, %p2333_p3 }
  0x95   :  { %2343 = shalt.err (!%p2340_p7)
}
  0x96   :  { %207 = dma.hbm_to_vmem [thread:$0]  %s3207_s15, 16, %s205_s7, [#allocation27]  }
  0x97   :  { %s2596_s0 = smov [#allocation2]   ;;  %s2597_s1 = smov [#allocation7]  }
  0x98   :  { %s37_s28 = sshll.u32 %s2596_s0, 4  ;;  %s61_s5 = sshll.u32 %s2597_s1, 4  ;;  %s38_s28 = int_to_ptr.vmem [resolvable:$true] %s37_s28  ;;  %s2842_s5 = int_to_ptr.vmem [resolvable:$true] %s61_s5 }
  0x99   :  { %s3221_s3 = sld [smem:[#allocation40_spill]] }
  0x9f   :  { %s2344_s11 = scalar_lea.hbm %s3221_s3, 256 }
  0xa0   :  { %p2345_p8 = scmp.ne.s32.totalorder %s3221_s3, %s2344_s11  ;;  %p2348_p9 = scmp.lt.u32.totalorder %s2344_s11, %s3221_s3 }
  0xa2   :  { %p2350_p10 = pnand %p2348_p9, %p2345_p8 }
  0xa4   :  { %2353 = shalt.err (!%p2350_p10)
}
  0xa5   :  { %s2354_s15 = scalar_lea.vmem %s38_s28, 256  ;;  %p2359_p12 = scmp.lt.s32.totalorder %s38_s28, %s38_s28 }
  0xa6   :  { %p2355_p11 = scmp.ne.s32.totalorder %s38_s28, %s2354_s15  ;;  %p2360_p13 = scmp.lt.s32.totalorder %s2354_s15, %s2354_s15 }
  0xa8   :  { %p2361_p0 = por %p2360_p13, %p2359_p12 }
  0xaa   :  { %p2362_p1 = pnand %p2361_p0, %p2355_p11 }
  0xac   :  { %2365 = shalt.err (!%p2362_p1)
}
  0xad   :  { %s3222_s7 = smov 8   ;;  %s3223_s17 = smov 128  }
  0xae   :  { %43 = dma.hbm_to_vmem [thread:$0]  %s3221_s3, 256, %s38_s28, [#allocation3], %s3223_s17, %s3223_s17, %s3222_s7  }
  0xaf   :  { %s2366_s18 = scalar_lea.hbm %s3194_s2, 32 }
  0xb0   :  { %p2367_p2 = scmp.ne.s32.totalorder %s3194_s2, %s2366_s18  ;;  %p2370_p3 = scmp.lt.u32.totalorder %s2366_s18, %s3194_s2 }
  0xb2   :  { %p2372_p4 = pnand %p2370_p3, %p2367_p2 }
  0xb4   :  { %2375 = shalt.err (!%p2372_p4)
}
  0xb5   :  { %s2376_s1 = scalar_lea.vmem %s2842_s5, 32  ;;  %p2381_p6 = scmp.lt.s32.totalorder %s2842_s5, %s2842_s5 }
  0xb6   :  { %p2377_p5 = scmp.ne.s32.totalorder %s2842_s5, %s2376_s1  ;;  %p2382_p7 = scmp.lt.s32.totalorder %s2376_s1, %s2376_s1 }
  0xb8   :  { %p2383_p8 = por %p2382_p7, %p2381_p6 }
  0xba   :  { %p2384_p9 = pnand %p2383_p8, %p2377_p5 }
  0xbc   :  { %2387 = shalt.err (!%p2384_p9)
}
  0xbd   :  { %s2598_s28 = smov 16   ;;  %s2599_s29 = smov 1  }
  0xbe   :  { %67 = dma.hbm_to_vmem [thread:$0]  %s3194_s2, 32, %s2842_s5, [#allocation6], %s2598_s28, %s2598_s28, %s2599_s29  }
  0xbf   :  { %s2600_s11 = smov [#allocation10]   ;;  %s2601_s24 = smov [#allocation13]  }
  0xc0   :  { %s86_s27 = sshll.u32 %s2600_s11, 4  ;;  %s108_s22 = sshll.u32 %s2601_s24, 4  ;;  %s87_s27 = int_to_ptr.vmem [resolvable:$true] %s86_s27  ;;  %s109_s22 = int_to_ptr.vmem [resolvable:$true] %s108_s22 }
  0xc1   :  { %s2388_s9 = scalar_lea.hbm %s3196_s4, 16 }
  0xc2   :  { %p2389_p10 = scmp.ne.s32.totalorder %s3196_s4, %s2388_s9  ;;  %p2392_p11 = scmp.lt.u32.totalorder %s2388_s9, %s3196_s4 }
  0xc4   :  { %p2394_p12 = pnand %p2392_p11, %p2389_p10 }
  0xc6   :  { %2397 = shalt.err (!%p2394_p12)
}
  0xc7   :  { %s2398_s2 = scalar_lea.vmem %s87_s27, 16  ;;  %s2402_s5 = scalar_lea.vmem %s87_s27, 32 }
  0xc8   :  { %p2399_p13 = scmp.ne.s32.totalorder %s87_s27, %s2398_s2  ;;  %p2403_p0 = scmp.lt.s32.totalorder %s87_s27, %s87_s27 }
  0xc9   :  { %p2404_p1 = scmp.lt.s32.totalorder %s2402_s5, %s2398_s2 }
  0xcb   :  { %p2405_p2 = por %p2404_p1, %p2403_p0 }
  0xcd   :  { %p2406_p3 = pnand %p2405_p2, %p2399_p13 }
  0xcf   :  { %2409 = shalt.err (!%p2406_p3)
}
  0xd0   :  { %89 = dma.hbm_to_vmem [thread:$0]  %s3196_s4, 16, %s87_s27, [#allocation9]  }
  0xd1   :  { %s2410_s1 = scalar_lea.hbm %s3198_s6, 16 }
  0xd2   :  { %p2411_p4 = scmp.ne.s32.totalorder %s3198_s6, %s2410_s1  ;;  %p2414_p5 = scmp.lt.u32.totalorder %s2410_s1, %s3198_s6 }
  0xd4   :  { %p2416_p6 = pnand %p2414_p5, %p2411_p4 }
  0xd6   :  { %2419 = shalt.err (!%p2416_p6)
}
  0xd7   :  { %s2420_s11 = scalar_lea.vmem %s109_s22, 16  ;;  %s2424_s24 = scalar_lea.vmem %s109_s22, 32 }
  0xd8   :  { %p2421_p7 = scmp.ne.s32.totalorder %s109_s22, %s2420_s11  ;;  %p2425_p8 = scmp.lt.s32.totalorder %s109_s22, %s109_s22 }
  0xd9   :  { %p2426_p9 = scmp.lt.s32.totalorder %s2424_s24, %s2420_s11 }
  0xdb   :  { %p2427_p10 = por %p2426_p9, %p2425_p8 }
  0xdd   :  { %p2428_p11 = pnand %p2427_p10, %p2421_p7 }
  0xdf   :  { %2431 = shalt.err (!%p2428_p11)
}
  0xe0   :  { %111 = dma.hbm_to_vmem [thread:$0]  %s3198_s6, 16, %s109_s22, [#allocation12]  }
  0xe1   :  { %s2602_s26 = smov [#allocation16]   ;;  %s2603_s9 = smov [#allocation19]  }
  0xe2   :  { %s130_s15 = sshll.u32 %s2602_s26, 4  ;;  %s150_s21 = sshll.u32 %s2603_s9, 4  ;;  %s131_s15 = int_to_ptr.vmem [resolvable:$true] %s130_s15  ;;  %s151_s21 = int_to_ptr.vmem [resolvable:$true] %s150_s21 }
  0xe3   :  { %s2432_s18 = scalar_lea.hbm %s3200_s8, 16 }
  0xe4   :  { %p2433_p12 = scmp.ne.s32.totalorder %s3200_s8, %s2432_s18  ;;  %p2436_p13 = scmp.lt.u32.totalorder %s2432_s18, %s3200_s8 }
  0xe6   :  { %p2438_p0 = pnand %p2436_p13, %p2433_p12 }
  0xe8   :  { %2441 = shalt.err (!%p2438_p0)
}
  0xe9   :  { %s2442_s6 = scalar_lea.vmem %s131_s15, 16  ;;  %s2446_s22 = scalar_lea.vmem %s131_s15, 32 }
  0xea   :  { %p2443_p1 = scmp.ne.s32.totalorder %s131_s15, %s2442_s6  ;;  %p2447_p2 = scmp.lt.s32.totalorder %s131_s15, %s131_s15 }
  0xeb   :  { %p2448_p3 = scmp.lt.s32.totalorder %s2446_s22, %s2442_s6 }
  0xed   :  { %p2449_p4 = por %p2448_p3, %p2447_p2 }
  0xef   :  { %p2450_p5 = pnand %p2449_p4, %p2443_p1 }
  0xf1   :  { %2453 = shalt.err (!%p2450_p5)
}
  0xf2   :  { %133 = dma.hbm_to_vmem [thread:$0]  %s3200_s8, 16, %s131_s15, [#allocation15]  }
  0xf3   :  { %s2454_s29 = scalar_lea.hbm %s3202_s10, 16 }
  0xf4   :  { %p2455_p6 = scmp.ne.s32.totalorder %s3202_s10, %s2454_s29  ;;  %p2458_p7 = scmp.lt.u32.totalorder %s2454_s29, %s3202_s10 }
  0xf6   :  { %p2460_p8 = pnand %p2458_p7, %p2455_p6 }
  0xf8   :  { %2463 = shalt.err (!%p2460_p8)
}
  0xf9   :  { %s2464_s4 = scalar_lea.vmem %s151_s21, 16  ;;  %s2468_s27 = scalar_lea.vmem %s151_s21, 32 }
  0xfa   :  { %p2465_p9 = scmp.ne.s32.totalorder %s151_s21, %s2464_s4  ;;  %p2469_p10 = scmp.lt.s32.totalorder %s151_s21, %s151_s21 }
  0xfb   :  { %p2470_p11 = scmp.lt.s32.totalorder %s2468_s27, %s2464_s4 }
  0xfd   :  { %p2471_p12 = por %p2470_p11, %p2469_p10 }
  0xff   :  { %p2472_p13 = pnand %p2471_p12, %p2465_p9 }
 0x101   :  { %2475 = shalt.err (!%p2472_p13)
}
 0x102   :  { %153 = dma.hbm_to_vmem [thread:$0]  %s3202_s10, 16, %s151_s21, [#allocation18]  }
 0x103   :  { %s2604_s15 = smov [#allocation22]   ;;  %s2605_s23 = smov [#allocation25]  }
 0x104   :  { %s172_s9 = sshll.u32 %s2604_s15, 4  ;;  %s194_s30 = sshll.u32 %s2605_s23, 4  ;;  %s173_s9 = int_to_ptr.vmem [resolvable:$true] %s172_s9  ;;  %s195_s30 = int_to_ptr.vmem [resolvable:$true] %s194_s30 }
 0x105   :  { %s2476_s5 = scalar_lea.hbm %s3204_s12, 16 }
 0x106   :  { %p2477_p0 = scmp.ne.s32.totalorder %s3204_s12, %s2476_s5  ;;  %p2480_p1 = scmp.lt.u32.totalorder %s2476_s5, %s3204_s12 }
 0x108   :  { %p2482_p2 = pnand %p2480_p1, %p2477_p0 }
 0x10a   :  { %2485 = shalt.err (!%p2482_p2)
}
 0x10b   :  { %s2486_s10 = scalar_lea.vmem %s173_s9, 16  ;;  %s2490_s21 = scalar_lea.vmem %s173_s9, 32 }
 0x10c   :  { %p2487_p3 = scmp.ne.s32.totalorder %s173_s9, %s2486_s10  ;;  %p2491_p4 = scmp.lt.s32.totalorder %s173_s9, %s173_s9 }
 0x10d   :  { %p2492_p5 = scmp.lt.s32.totalorder %s2490_s21, %s2486_s10 }
 0x10f   :  { %p2493_p6 = por %p2492_p5, %p2491_p4 }
 0x111   :  { %p2494_p7 = pnand %p2493_p6, %p2487_p3 }
 0x113   :  { %2497 = shalt.err (!%p2494_p7)
}
 0x114   :  { %175 = dma.hbm_to_vmem [thread:$0]  %s3204_s12, 16, %s173_s9, [#allocation21]  }
 0x115   :  { %s2498_s29 = scalar_lea.hbm %s3206_s14, 16 }
 0x116   :  { %p2499_p8 = scmp.ne.s32.totalorder %s3206_s14, %s2498_s29  ;;  %p2502_p9 = scmp.lt.u32.totalorder %s2498_s29, %s3206_s14 }
 0x118   :  { %p2504_p10 = pnand %p2502_p9, %p2499_p8 }
 0x11a   :  { %2507 = shalt.err (!%p2504_p10)
}
 0x11b   :  { %s2508_s4 = scalar_lea.vmem %s195_s30, 16  ;;  %s2512_s27 = scalar_lea.vmem %s195_s30, 32 }
 0x11c   :  { %p2509_p11 = scmp.ne.s32.totalorder %s195_s30, %s2508_s4  ;;  %p2513_p12 = scmp.lt.s32.totalorder %s195_s30, %s195_s30 }
 0x11d   :  { %p2514_p13 = scmp.lt.s32.totalorder %s2512_s27, %s2508_s4 }
 0x11f   :  { %p2515_p0 = por %p2514_p13, %p2513_p12 }
 0x121   :  { %p2516_p1 = pnand %p2515_p0, %p2509_p11 }
 0x123   :  { %2519 = shalt.err (!%p2516_p1)
}
 0x124   :  { %197 = dma.hbm_to_vmem [thread:$0]  %s3206_s14, 16, %s195_s30, [#allocation24]  }
 0x125   :  { %s2606_s26 = smov [#allocation28]   ;;  %s2520_s18 = scalar_lea.hbm %s3208_s16, 16 }
 0x126   :  { %s214_s15 = sshll.u32 %s2606_s26, 4  ;;  %p2521_p2 = scmp.ne.s32.totalorder %s3208_s16, %s2520_s18  ;;  %s215_s15 = int_to_ptr.vmem [resolvable:$true] %s214_s15 }
 0x127   :  { %p2524_p3 = scmp.lt.u32.totalorder %s2520_s18, %s3208_s16 }
 0x129   :  { %p2526_p4 = pnand %p2524_p3, %p2521_p2 }
 0x12b   :  { %2529 = shalt.err (!%p2526_p4)
}
 0x12c   :  { %s2530_s6 = scalar_lea.vmem %s215_s15, 16  ;;  %s2534_s14 = scalar_lea.vmem %s215_s15, 32 }
 0x12d   :  { %p2531_p5 = scmp.ne.s32.totalorder %s215_s15, %s2530_s6  ;;  %p2535_p6 = scmp.lt.s32.totalorder %s215_s15, %s215_s15 }
 0x12e   :  { %p2536_p7 = scmp.lt.s32.totalorder %s2534_s14, %s2530_s6 }
 0x130   :  { %p2537_p8 = por %p2536_p7, %p2535_p6 }
 0x132   :  { %p2538_p9 = pnand %p2537_p8, %p2531_p5 }
 0x134   :  { %2541 = shalt.err (!%p2538_p9)
}
 0x135   :  { %217 = dma.hbm_to_vmem [thread:$0]  %s3208_s16, 16, %s215_s15, [#allocation27]  }
 0x136   :  { %2564 = dma.done.wait [#allocation3], 256  }
 0x137   :  { %2565 = vsyncadd [#allocation3], 4294967040 }
 0x138   :  { %2566 = dma.done.wait [#allocation6], 544  }
 0x139   :  { %2567 = vsyncadd [#allocation6], 4294966752 }
 0x13a   :  { %2568 = dma.done.wait [#allocation9], 272  }
 0x13b   :  { %2569 = vsyncadd [#allocation9], 4294967024 }
 0x13c   :  { %2570 = dma.done.wait [#allocation12], 272  }
 0x13d   :  { %2571 = vsyncadd [#allocation12], 4294967024 }
 0x13e   :  { %2572 = dma.done.wait [#allocation15], 272  }
 0x13f   :  { %2573 = vsyncadd [#allocation15], 4294967024 }
 0x140   :  { %2574 = dma.done.wait [#allocation18], 32  }
 0x141   :  { %2575 = vsyncadd [#allocation18], 4294967264 }
 0x142   :  { %2576 = dma.done.wait [#allocation21], 272  }
 0x143   :  { %2577 = vsyncadd [#allocation21], 4294967024 }
 0x144   :  { %2578 = dma.done.wait [#allocation24], 528  }
 0x145   :  { %2579 = vsyncadd [#allocation24], 4294966768 }
 0x146   :  { %2580 = dma.done.wait [#allocation27], 32  }
 0x147   :  { %2581 = vsyncadd [#allocation27], 4294967264  ;;  %v2607_v0 = vmov 0.0   ;;  %vm2608_vm0 = vmmov 0   ;;  %v2110_v1 = vld [vmem:[#allocation11] sm:$0xff]   ;;  %v2111_v2 = vld [vmem:[#allocation11 + $0x8] sm:$0xff]   ;;  %v437_v37 = vlaneseq }
 0x148   :  { %1921 = vmatprep.subr.bf16.mxu0 %v2607_v0  ;;  %1925 = vmatprep.mubr.msk.bf16.mxu0 %vm2608_vm0, %v2607_v0  ;;  %v273_v3 = vld [vmem:[#allocation5] sm:$0xff]  ;;  %v274_v4 = vld [vmem:[#allocation5 + $0x8] sm:$0xff]  ;;  %vm302_vm1 = vcmask 261120   ;;  %v275_v5 = vld [vmem:[#allocation5 + $0x10] sm:$0xff]  ;;  %vm451_vm2 = vcmask 64512   ;;  %s2609_s16 = smov 96  }
 0x149   :  { %1929 = vmatprep.subr.bf16.mxu1 %v2110_v1  ;;  %v277_v6 = vpack.c.bf16 %v274_v4, %v273_v3  ;;  %v276_v7 = vld [vmem:[#allocation5 + $0x18] sm:$0xff]  ;;  %v2112_v8 = vld [vmem:[#allocation8] sm:$0xff]   ;;  %v2113_v9 = vld [vmem:[#allocation8 + $0x8] sm:$0xff]   ;;  %s2610_s10 = smov 120   ;;  %v438_v39 = vshrl.u32 %v437_v37, 7  ;;  %vm544_vm5 = vcmask 130048  }
 0x14a   :  { %1930 = vmatpush3.bf16.msra.mxu1 %v2110_v1  ;;  %v2964_v10 = vld [vmem:[#allocation2] sm:$0xff]  ;;  %v2966_v11 = vld [vmem:[#allocation2 + $0x8] sm:$0xff]  ;;  %v278_v12 = vpack.c.bf16 %v276_v7, %v275_v5  ;;  %1922 = vmatpush3.bf16.msra.mxu0 %v2112_v8  ;;  %v1826_v15 = vld [vmem:[#allocation13] ss:$0 sm:$0xff]  ;;  %s2611_s21 = smov 88   ;;  %s2612_s25 = smov 112  }
 0x14b   :  { %1931 = vmatprep.subr.bf16.mxu1 %v2111_v2  ;;  %1933 = vmatprep.mubr.msk.bf16.mxu1 %vm302_vm1, %v277_v6  ;;  %v272_v13 = vpack.c.bf16 %v2966_v11, %v2964_v10  ;;  %v1822_v24 = vld [vmem:[#allocation10] ss:$0 sm:$0xff]  ;;  %v429_v38 = vld [vmem:[#allocation7] sm:$0x1]  ;;  %v430_v40 = vld [vmem:[#allocation7 + $0x1] sm:$0x1] }
 0x14c   :  { %1923 = vmatprep.subr.bf16.mxu0 %v2607_v0  ;;  %vm431_vm3 = vcmp.eq.f32.partialorder %v429_v38, 0.0  ;;  %vm432_vm4 = vcmp.eq.f32.partialorder %v430_v40, 0.0  ;;  %v439_v41 = vsub.s32 0, %v438_v39  ;;  %vm886_vm6 = vcmask 1043456   ;;  %s2613_s0 = smov 80   ;;  %s2614_s1 = smov 104  }
 0x14d   :  { %v433_v42 = vsel %vm431_vm3, -1e+09, %v2607_v0  ;;  %v434_v43 = vsel %vm432_vm4, -1e+09, %v2607_v0  ;;  %s2615_s28 = smov 72   ;;  %vm1690_vm11 = vcmask 523264  }
 0x14e   :  { %1932 = vmatpush3.bf16.msra.mxu1 %v2111_v2  ;;  %1924 = vmatpush3.bf16.msra.mxu0 %v2113_v9  ;;  %v3008_v44 = vrot.slane %v433_v42, %v439_v41  ;;  %v3010_v45 = vrot.slane %v434_v43, %v439_v41  ;;  %s2616_s29 = smov [#allocation29]  }
 0x14f   :  { %1943 = vmatprep.subr.bf16.mxu1 %v2607_v0  ;;  %1937 = vmatprep.subr.bf16.mxu0 %v2607_v0  ;;  %s1802_s20 = sshll.u32 %s2616_s29, 4  ;;  %s1803_s20 = int_to_ptr.vmem [resolvable:$true] %s1802_s20 }
 0x150   :  { %s2542_s3 = scalar_lea.vmem %s1803_s20, 256  ;;  %p2547_p11 = scmp.lt.s32.totalorder %s1803_s20, %s1803_s20 }
 0x151   :  { %1934 = vmatmul.mubr.msk.bf16.vlgmr.msra.gmra.mrb[0].mxu1 %vm302_vm1, %v278_v12  ;;  %1926 = vmatmul.mubr.msk.bf16.vlgmr.msra.gmra.mrb[0].mxu0 %vm302_vm1, %v272_v13  ;;  %p2543_p10 = scmp.ne.s32.totalorder %s1803_s20, %s2542_s3  ;;  %p2548_p12 = scmp.lt.s32.totalorder %s2542_s3, %s2542_s3 }
 0x152   :  { %1945 = vmatprep.mubr.msk.bf16.mxu1 %vm2608_vm0, %v2607_v0  ;;  %1939 = vmatprep.mubr.msk.bf16.mxu0 %vm2608_vm0, %v2607_v0 }
 0x153   :  { %p2549_p13 = por %p2548_p12, %p2547_p11 }
 0x155   :  { %p2550_p0 = pnand %p2549_p13, %p2543_p10 }
 0x224   :  { %v1935_v14 = vpop.f32.mrb[0].mxu1  ;;  %v340_v21 = vpop.f32.mrb[0].mxu0 }
 0x225   :  { %v410_v16 = vpop.f32.mrb[1].mxu1  ;;  %v419_v18 = vadd.f32 %v1935_v14, %v1826_v15  ;;  %v1927_v25 = vpop.f32.mrb[1].mxu0  ;;  %v341_v32 = vadd.f32 %v1822_v24, %v340_v21 }
 0x226   :  { %v1936_v17 = vpop.f32.mrb[2].mxu1  ;;  %v411_v22 = vadd.f32 %v1826_v15, %v410_v16  ;;  %v343_v27 = vpop.f32.mrb[2].mxu0 }
 0x227   :  { %v422_v19 = vadd.f32 %v1936_v17, %v1826_v15  ;;  %v413_v20 = vpop.f32.mrb[3].mxu1  ;;  %v1928_v29 = vpop.f32.mrb[3].mxu0  ;;  %v344_v31 = vadd.f32 %v1822_v24, %v343_v27  ;;  %v2995_v35 = vpack.c.bf16 %v341_v32, %v341_v32 }
 0x228   :  { %v414_v23 = vadd.f32 %v1826_v15, %v413_v20 }
 0x229   :  { %v2979_v26 = vpack.c.bf16 %v422_v19, %v419_v18  ;;  %v2991_v34 = vpack.c.bf16 %v344_v31, %v344_v31 }
 0x22a   :  { %v2981_v28 = vpack.c.bf16 %v414_v23, %v411_v22 }
 0x22b   :  { %617 = vrot.lane.b32.xlu1 %v2979_v26, %s2609_s16  ;;  %v502_v30 = vsel %vm451_vm2, %v2979_v26, 0 }
 0x22c   :  { %1944 = vmatpush3.bf16.xpose.msra.mxu1 %v502_v30  ;;  %v456_v33 = vsel %vm451_vm2, %v2981_v28, 0 }
 0x22d   :  { %1938 = vmatpush3.bf16.xpose.msra.mxu0 %v456_v33  ;;  %1955 = vmatprep.subr.bf16.mxu1 %v2607_v0 }
 0x22e   :  { %1949 = vmatprep.subr.bf16.mxu0 %v2607_v0 }
 0x22f   :  { %667 = vrot.lane.b32.xlu1 %v2981_v28, %s2610_s10 }
 0x233   :  { %1946 = vmatmul.mubr.msk.bf16.vlgmr.msra.gmra.mrb[4].mxu1 %vm451_vm2, %v2991_v34 }
 0x234   :  { %1940 = vmatmul.mubr.msk.bf16.vlgmr.msra.gmra.mrb[4].mxu0 %vm451_vm2, %v2995_v35  ;;  %1957 = vmatprep.mubr.msk.bf16.mxu1 %vm2608_vm0, %v2607_v0 }
 0x235   :  { %1951 = vmatprep.mubr.msk.bf16.mxu0 %vm2608_vm0, %v2607_v0 }
 0x29d   :  { %v618_v36 = vpop.permute.xlu1 %617 }
 0x29e   :  { %1956 = vmatpush3.bf16.msra.mxu1 %v618_v36 }
 0x29f   :  { %1967 = vmatprep.subr.bf16.mxu1 %v2607_v0 }
 0x2a1   :  { %v668_v6 = vpop.permute.xlu1 %667 }
 0x2a2   :  { %v673_v19 = vsel %vm451_vm2, %v668_v6, 0  ;;  %v448_v6 = vld [vmem:[#allocation14 + $0x4] sm:$0xf] }
 0x306   :  { %v538_v46 = vpop.f32.mrb[4].mxu1 }
 0x307   :  { %v492_v47 = vpop.f32.mrb[4].mxu0  ;;  %v1947_v48 = vpop.f32.mrb[5].mxu1  ;;  %v539_v54 = vadd.f32 %v538_v46, %v3010_v45 }
 0x308   :  { %v493_v49 = vadd.f32 %v492_v47, %v3008_v44  ;;  %v1941_v50 = vpop.f32.mrb[5].mxu0  ;;  %v541_v51 = vpop.f32.mrb[6].mxu1 }
 0x309   :  { %v495_v52 = vpop.f32.mrb[6].mxu0  ;;  %v1948_v53 = vpop.f32.mrb[7].mxu1  ;;  %v548_v57 = vsel %vm544_vm5, %v539_v54, -inf }
 0x30a   :  { %v1942_v55 = vpop.f32.mrb[7].mxu0  ;;  %v545_v56 = vsel %vm544_vm5, %v493_v49, -inf }
 0x30b   :  { %546 = vmax.xlane.f32.xlu0 %v545_v56 }
 0x30f   :  { %549 = vmax.xlane.f32.xlu0 %v548_v57 }
 0x325   :  { %570 = vrot.lane.b32.xlu0 %v2981_v28, %s2609_s16 }
 0x329   :  { %665 = vrot.lane.b32.xlu0 %v2995_v35, %s2610_s10 }
 0x398   :  { %v547_v58 = vpop.xlane.xlu0 %546 }
 0x399   :  { %v551_v59 = vsub.f32 %v493_v49, %v547_v58 }
 0x39b   :  { %v553_v62 = vmul.f32 1.442695, %v551_v59 }
 0x39c   :  { %v550_v60 = vpop.xlane.xlu0 %549 }
 0x39d   :  { %v552_v61 = vsub.f32 %v539_v54, %v550_v60 }
 0x39f   :  { %v555_v63 = vmul.f32 1.442695, %v552_v61 }
 0x3a0   :  { %v571_v1 = vpop.permute.xlu0 %570 }
 0x3a1   :  { %2120 = vpow2.f32 %v555_v63  ;;  %1950 = vmatpush3.bf16.msra.mxu0 %v571_v1  ;;  %v447_v1 = vld [vmem:[#allocation14] sm:$0xf] }
 0x3a2   :  { %1961 = vmatprep.subr.bf16.mxu0 %v2607_v0  ;;  %2122 = vpow2.f32 %v553_v62 }
 0x3a4   :  { %v666_v21 = vpop.permute.xlu0 %665 }
 0x3ab   :  { %v2121_v2 = vpop.eup %2120 }
 0x3ac   :  { %v560_v3 = vsel %vm544_vm5, %v2121_v2, 0.0  ;;  %v2123_v4 = vpop.eup %2122 }
 0x3ad   :  { %561 = vadd.xlane.f32.xlu1 %v560_v3  ;;  %v557_v5 = vsel %vm544_vm5, %v2123_v4, 0.0 }
 0x3b1   :  { %558 = vadd.xlane.f32.xlu1 %v557_v5 }
 0x3c2   :  { %718 = vrot.lane.b32.xlu1 %v2979_v26, %s2610_s10 }
 0x3c6   :  { %716 = vrot.lane.b32.xlu1 %v2991_v34, %s2610_s10 }
 0x43a   :  { %v562_v7 = vpop.xlane.xlu1 %561 }
 0x43b   :  { %2124 = vrcp.f32 %v562_v7 }
 0x43e   :  { %v559_v8 = vpop.xlane.xlu1 %558 }
 0x43f   :  { %2126 = vrcp.f32 %v559_v8 }
 0x442   :  { %v719_v13 = vpop.permute.xlu1 %718 }
 0x443   :  { %v724_v17 = vsel %vm451_vm2, %v719_v13, 0 }
 0x445   :  { %v2125_v9 = vpop.eup %2124 }
 0x446   :  { %v566_v12 = vmul.f32 %v2125_v9, %v2121_v2  ;;  %v717_v20 = vpop.permute.xlu1 %716 }
 0x448   :  { %v568_v14 = vpack.c.bf16 %v566_v12, %v566_v12  ;;  %v888_v12 = vsel %vm886_vm6, %v448_v6, 0 }
 0x449   :  { %v2127_v15 = vpop.eup %2126 }
 0x44a   :  { %v565_v16 = vmul.f32 %v2127_v15, %v2123_v4  ;;  %1958 = vmatmul.mubr.msk.bf16.vlgmr.msra.gmra.mrb[8].mxu1 %vm544_vm5, %v568_v14  ;;  %v935_v4 = vsel %vm886_vm6, %v447_v1, 0 }
 0x44b   :  { %1968 = vmatpush3.bf16.xpose.msra.mxu1 %v724_v17  ;;  %1969 = vmatprep.mubr.msk.bf16.mxu1 %vm2608_vm0, %v2607_v0 }
 0x44c   :  { %v567_v18 = vpack.c.bf16 %v565_v16, %v565_v16  ;;  %1979 = vmatprep.subr.bf16.mxu1 %v2607_v0 }
 0x44e   :  { %1952 = vmatmul.mubr.msk.bf16.vlgmr.msra.gmra.mrb[8].mxu0 %vm544_vm5, %v567_v18 }
 0x44f   :  { %1962 = vmatpush3.bf16.xpose.msra.mxu0 %v673_v19  ;;  %1963 = vmatprep.mubr.msk.bf16.mxu0 %vm2608_vm0, %v2607_v0 }
 0x450   :  { %1973 = vmatprep.subr.bf16.mxu0 %v2607_v0 }
 0x452   :  { %1970 = vmatmul.mubr.msk.bf16.vlgmr.msra.gmra.mrb[12].mxu1 %vm451_vm2, %v717_v20 }
 0x453   :  { %1981 = vmatprep.mubr.msk.bf16.mxu1 %vm2608_vm0, %v2607_v0 }
 0x456   :  { %1964 = vmatmul.mubr.msk.bf16.vlgmr.msra.gmra.mrb[12].mxu0 %vm451_vm2, %v666_v21 }
 0x457   :  { %1975 = vmatprep.mubr.msk.bf16.mxu0 %vm2608_vm0, %v2607_v0 }
 0x51d   :  { %v3043_v22 = vpop.f32.mrb[8].mxu1 }
 0x51e   :  { %v1959_v23 = vpop.f32.mrb[9].mxu1 }
 0x51f   :  { %v660_v24 = vpop.f32.mrb[10].mxu1 }
 0x520   :  { %v1960_v25 = vpop.f32.mrb[11].mxu1 }
 0x521   :  { %v3045_v27 = vpop.f32.mrb[8].mxu0 }
 0x522   :  { %v663_v29 = vpack.c.bf16 %v3043_v22, %v3045_v27  ;;  %v1953_v30 = vpop.f32.mrb[9].mxu0 }
 0x523   :  { %v613_v31 = vpop.f32.mrb[10].mxu0 }
 0x524   :  { %v1954_v32 = vpop.f32.mrb[11].mxu0 }
 0x525   :  { %v760_v33 = vpop.f32.mrb[12].mxu1 }
 0x526   :  { %v761_v36 = vadd.f32 %v760_v33, %v3010_v45  ;;  %v1971_v37 = vpop.f32.mrb[13].mxu1 }
 0x527   :  { %v763_v38 = vpop.f32.mrb[14].mxu1 }
 0x528   :  { %v1972_v39 = vpop.f32.mrb[15].mxu1  ;;  %v769_v40 = vsel %vm544_vm5, %v761_v36, -inf }
 0x529   :  { %770 = vmax.xlane.f32.xlu1 %v769_v40  ;;  %v709_v41 = vpop.f32.mrb[12].mxu0 }
 0x52a   :  { %v710_v42 = vadd.f32 %v709_v41, %v3008_v44  ;;  %v1965_v43 = vpop.f32.mrb[13].mxu0 }
 0x52b   :  { %v712_v46 = vpop.f32.mrb[14].mxu0 }
 0x52c   :  { %v1966_v47 = vpop.f32.mrb[15].mxu0  ;;  %v766_v48 = vsel %vm544_vm5, %v710_v42, -inf }
 0x52d   :  { %767 = vmax.xlane.f32.xlu0 %v766_v48 }
 0x53a   :  { %836 = vrot.lane.b32.xlu1 %v2979_v26, %s2611_s21 }
 0x53e   :  { %980 = vrot.lane.b32.xlu1 %v2981_v28, %s2612_s25 }
 0x542   :  { %1030 = vrot.lane.b32.xlu1 %v2979_v26, %s2612_s25 }
 0x546   :  { %1028 = vrot.lane.b32.xlu1 %v2991_v34, %s2612_s25 }
 0x5b6   :  { %v771_v49 = vpop.xlane.xlu1 %770 }
 0x5b7   :  { %v773_v50 = vsub.f32 %v761_v36, %v771_v49 }
 0x5b9   :  { %v776_v51 = vmul.f32 1.442695, %v773_v50 }
 0x5ba   :  { %v837_v52 = vpop.permute.xlu1 %836  ;;  %v768_v53 = vpop.xlane.xlu0 %767 }
 0x5bb   :  { %2128 = vpow2.f32 %v776_v51  ;;  %v772_v54 = vsub.f32 %v710_v42, %v768_v53  ;;  %1980 = vmatpush3.bf16.msra.mxu1 %v837_v52 }
 0x5bc   :  { %1991 = vmatprep.subr.bf16.mxu1 %v2607_v0 }
 0x5bd   :  { %v774_v55 = vmul.f32 1.442695, %v772_v54 }
 0x5be   :  { %v981_v7 = vpop.permute.xlu1 %980 }
 0x5bf   :  { %2130 = vpow2.f32 %v774_v55  ;;  %v986_v24 = vsel %vm451_vm2, %v981_v7, 0 }
 0x5c2   :  { %v1031_v13 = vpop.permute.xlu1 %1030 }
 0x5c3   :  { %v1036_v14 = vsel %vm451_vm2, %v1031_v13, 0 }
 0x5c5   :  { %v2129_v56 = vpop.eup %2128 }
 0x5c6   :  { %v781_v57 = vsel %vm544_vm5, %v2129_v56, 0.0  ;;  %v1029_v15 = vpop.permute.xlu1 %1028 }
 0x5c7   :  { %782 = vadd.xlane.f32.xlu0 %v781_v57 }
 0x5c9   :  { %v2131_v58 = vpop.eup %2130 }
 0x5ca   :  { %v778_v59 = vsel %vm544_vm5, %v2131_v58, 0.0 }
 0x5cb   :  { %779 = vadd.xlane.f32.xlu0 %v778_v59 }
 0x5e1   :  { %790 = vrot.lane.b32.xlu0 %v2981_v28, %s2611_s21 }
 0x5e5   :  { %978 = vrot.lane.b32.xlu0 %v2995_v35, %s2612_s25 }
 0x654   :  { %v783_v60 = vpop.xlane.xlu0 %782 }
 0x655   :  { %2132 = vrcp.f32 %v783_v60 }
 0x658   :  { %v780_v61 = vpop.xlane.xlu0 %779 }
 0x659   :  { %2134 = vrcp.f32 %v780_v61 }
 0x65c   :  { %v791_v62 = vpop.permute.xlu0 %790 }
 0x65d   :  { %1974 = vmatpush3.bf16.msra.mxu0 %v791_v62 }
 0x65e   :  { %1985 = vmatprep.subr.bf16.mxu0 %v2607_v0 }
 0x65f   :  { %v2133_v63 = vpop.eup %2132 }
 0x660   :  { %v787_v2 = vmul.f32 %v2133_v63, %v2129_v56  ;;  %v979_v32 = vpop.permute.xlu0 %978 }
 0x662   :  { %v789_v3 = vpack.c.bf16 %v787_v2, %v787_v2 }
 0x663   :  { %v2135_v5 = vpop.eup %2134 }
 0x664   :  { %v786_v8 = vmul.f32 %v2135_v5, %v2131_v58  ;;  %1982 = vmatmul.mubr.msk.bf16.vlgmr.msra.gmra.mrb[16].mxu1 %vm544_vm5, %v789_v3 }
 0x665   :  { %1992 = vmatpush3.bf16.msra.mxu1 %v935_v4  ;;  %1993 = vmatprep.mubr.msk.bf16.mxu1 %vm2608_vm0, %v2607_v0 }
 0x666   :  { %v788_v9 = vpack.c.bf16 %v786_v8, %v786_v8  ;;  %2003 = vmatprep.subr.bf16.mxu1 %v2607_v0 }
 0x668   :  { %1976 = vmatmul.mubr.msk.bf16.vlgmr.msra.gmra.mrb[16].mxu0 %vm544_vm5, %v788_v9 }
 0x669   :  { %1986 = vmatpush3.bf16.msra.mxu0 %v888_v12  ;;  %1987 = vmatprep.mubr.msk.bf16.mxu0 %vm2608_vm0, %v2607_v0 }
 0x66a   :  { %1997 = vmatprep.subr.bf16.mxu0 %v2607_v0 }
 0x66c   :  { %1994 = vmatmul.mubr.msk.bf16.vlgmr.msra.gmra.mrb[20].mxu1 %vm451_vm2, %v663_v29 }
 0x66d   :  { %2005 = vmatprep.mubr.msk.bf16.mxu1 %vm2608_vm0, %v2607_v0 }
 0x66e   :  { %2004 = vmatpush3.bf16.xpose.msra.mxu1 %v1036_v14 }
 0x66f   :  { %2015 = vmatprep.subr.bf16.mxu1 %v2607_v0 }
 0x675   :  { %2006 = vmatmul.mubr.msk.bf16.vlgmr.msra.gmra.mrb[24].mxu1 %vm451_vm2, %v1029_v15 }
 0x676   :  { %2017 = vmatprep.mubr.msk.bf16.mxu1 %vm2608_vm0, %v2607_v0 }
 0x737   :  { %v876_v16 = vpop.f32.mrb[16].mxu1 }
 0x738   :  { %v1983_v17 = vpop.f32.mrb[17].mxu1 }
 0x739   :  { %v879_v18 = vpop.f32.mrb[18].mxu1 }
 0x73a   :  { %v1984_v19 = vpop.f32.mrb[19].mxu1 }
 0x73b   :  { %v830_v20 = vpop.f32.mrb[16].mxu0  ;;  %v449_v19 = vld [vmem:[#allocation14 + $0x8] sm:$0xf] }
 0x73c   :  { %v882_v21 = vpack.c.bf16 %v876_v16, %v830_v20  ;;  %v1977_v22 = vpop.f32.mrb[17].mxu0  ;;  %v1199_v20 = vsel %vm886_vm6, %v449_v19, 0 }
 0x73d   :  { %v833_v23 = vpop.f32.mrb[18].mxu0 }
 0x73e   :  { %v1978_v25 = vpop.f32.mrb[19].mxu0  ;;  %1988 = vmatmul.mubr.msk.bf16.vlgmr.msra.gmra.mrb[20].mxu0 %vm451_vm2, %v882_v21 }
 0x73f   :  { %1998 = vmatpush3.bf16.xpose.msra.mxu0 %v986_v24  ;;  %v971_v27 = vpop.f32.mrb[20].mxu1  ;;  %1999 = vmatprep.mubr.msk.bf16.mxu0 %vm2608_vm0, %v2607_v0 }
 0x740   :  { %v1995_v29 = vpop.f32.mrb[21].mxu1  ;;  %2009 = vmatprep.subr.bf16.mxu0 %v2607_v0 }
 0x741   :  { %v974_v30 = vpop.f32.mrb[22].mxu1 }
 0x742   :  { %v1996_v31 = vpop.f32.mrb[23].mxu1 }
 0x746   :  { %2000 = vmatmul.mubr.msk.bf16.vlgmr.msra.gmra.mrb[24].mxu0 %vm451_vm2, %v979_v32 }
 0x747   :  { %2011 = vmatprep.mubr.msk.bf16.mxu0 %vm2608_vm0, %v2607_v0 }
 0x748   :  { %v1072_v33 = vpop.f32.mrb[24].mxu1 }
 0x749   :  { %v1073_v36 = vadd.f32 %v1072_v33, %v3010_v45  ;;  %v2007_v37 = vpop.f32.mrb[25].mxu1 }
 0x74a   :  { %v1075_v38 = vpop.f32.mrb[26].mxu1 }
 0x74b   :  { %v2008_v39 = vpop.f32.mrb[27].mxu1  ;;  %v1081_v40 = vsel %vm544_vm5, %v1073_v36, -inf }
 0x74c   :  { %1082 = vmax.xlane.f32.xlu1 %v1081_v40 }
 0x75d   :  { %1148 = vrot.lane.b32.xlu1 %v2979_v26, %s2613_s0 }
 0x761   :  { %1246 = vrot.lane.b32.xlu1 %v2981_v28, %s2614_s1 }
 0x765   :  { %1296 = vrot.lane.b32.xlu1 %v2979_v26, %s2614_s1 }
 0x769   :  { %1294 = vrot.lane.b32.xlu1 %v2991_v34, %s2614_s1 }
 0x7d9   :  { %v1083_v41 = vpop.xlane.xlu1 %1082 }
 0x7da   :  { %v1085_v43 = vsub.f32 %v1073_v36, %v1083_v41 }
 0x7dc   :  { %v1088_v46 = vmul.f32 1.442695, %v1085_v43 }
 0x7dd   :  { %v1149_v42 = vpop.permute.xlu1 %1148 }
 0x7de   :  { %2016 = vmatpush3.bf16.msra.mxu1 %v1149_v42  ;;  %2136 = vpow2.f32 %v1088_v46 }
 0x7df   :  { %2027 = vmatprep.subr.bf16.mxu1 %v2607_v0 }
 0x7e1   :  { %v1247_v5 = vpop.permute.xlu1 %1246 }
 0x7e2   :  { %v1252_v7 = vsel %vm451_vm2, %v1247_v5, 0 }
 0x7e5   :  { %v1297_v29 = vpop.permute.xlu1 %1296 }
 0x7e6   :  { %v1302_v36 = vsel %vm451_vm2, %v1297_v29, 0 }
 0x7e8   :  { %v2137_v58 = vpop.eup %2136 }
 0x7e9   :  { %v1093_v59 = vsel %vm544_vm5, %v2137_v58, 0.0 }
 0x811   :  { %v924_v47 = vpop.f32.mrb[20].mxu0 }
 0x812   :  { %v3103_v48 = vadd.f32 %v971_v27, %v924_v47  ;;  %v1989_v49 = vpop.f32.mrb[21].mxu0 }
 0x813   :  { %v927_v50 = vpop.f32.mrb[22].mxu0 }
 0x814   :  { %v3105_v51 = vadd.f32 %v974_v30, %v927_v50  ;;  %v1990_v52 = vpop.f32.mrb[23].mxu0 }
 0x819   :  { %v1022_v53 = vpop.f32.mrb[24].mxu0 }
 0x81a   :  { %v1023_v54 = vadd.f32 %v1022_v53, %v3008_v44  ;;  %v2001_v34 = vpop.f32.mrb[25].mxu0 }
 0x81b   :  { %v1025_v55 = vpop.f32.mrb[26].mxu0 }
 0x81c   :  { %v2002_v56 = vpop.f32.mrb[27].mxu0  ;;  %v1078_v57 = vsel %vm544_vm5, %v1023_v54, -inf }
 0x81d   :  { %1079 = vmax.xlane.f32.xlu0 %v1078_v57 }
 0x821   :  { %1094 = vadd.xlane.f32.xlu0 %v1093_v59 }
 0x8aa   :  { %v1080_v60 = vpop.xlane.xlu0 %1079 }
 0x8ab   :  { %v1084_v61 = vsub.f32 %v1023_v54, %v1080_v60 }
 0x8ad   :  { %v1086_v62 = vmul.f32 1.442695, %v1084_v61 }
 0x8ae   :  { %v1095_v63 = vpop.xlane.xlu0 %1094 }
 0x8af   :  { %2138 = vpow2.f32 %v1086_v62 }
 0x8b0   :  { %2140 = vrcp.f32 %v1095_v63 }
 0x8b9   :  { %v2139_v1 = vpop.eup %2138 }
 0x8ba   :  { %v2141_v2 = vpop.eup %2140  ;;  %v1090_v3 = vsel %vm544_vm5, %v2139_v1, 0.0 }
 0x8bb   :  { %v1099_v4 = vmul.f32 %v2141_v2, %v2137_v58  ;;  %1091 = vadd.xlane.f32.xlu0 %v1090_v3 }
 0x8bd   :  { %v1101_v6 = vpack.c.bf16 %v1099_v4, %v1099_v4 }
 0x8bf   :  { %2018 = vmatmul.mubr.msk.bf16.vlgmr.msra.gmra.mrb[28].mxu1 %vm544_vm5, %v1101_v6 }
 0x8c0   :  { %2028 = vmatpush3.bf16.xpose.msra.mxu1 %v1252_v7  ;;  %2029 = vmatprep.mubr.msk.bf16.mxu1 %vm2608_vm0, %v2607_v0 }
 0x8c1   :  { %2039 = vmatprep.subr.bf16.mxu1 %v2607_v0 }
 0x8d1   :  { %1102 = vrot.lane.b32.xlu0 %v2981_v28, %s2613_s0 }
 0x8d5   :  { %1244 = vrot.lane.b32.xlu0 %v2995_v35, %s2614_s1 }
 0x948   :  { %v1092_v8 = vpop.xlane.xlu0 %1091 }
 0x949   :  { %2142 = vrcp.f32 %v1092_v8 }
 0x94c   :  { %v1103_v9 = vpop.permute.xlu0 %1102 }
 0x94d   :  { %2010 = vmatpush3.bf16.msra.mxu0 %v1103_v9 }
 0x94e   :  { %2021 = vmatprep.subr.bf16.mxu0 %v2607_v0 }
 0x950   :  { %v1245_v12 = vpop.permute.xlu0 %1244 }
 0x951   :  { %2030 = vmatmul.mubr.msk.bf16.vlgmr.msra.gmra.mrb[32].mxu1 %vm451_vm2, %v1245_v12 }
 0x952   :  { %2041 = vmatprep.mubr.msk.bf16.mxu1 %vm2608_vm0, %v2607_v0 }
 0x953   :  { %v2143_v13 = vpop.eup %2142 }
 0x954   :  { %v1098_v14 = vmul.f32 %v2143_v13, %v2139_v1 }
 0x956   :  { %v1100_v15 = vpack.c.bf16 %v1098_v14, %v1098_v14 }
 0x958   :  { %2012 = vmatmul.mubr.msk.bf16.vlgmr.msra.gmra.mrb[28].mxu0 %vm544_vm5, %v1100_v15 }
 0x959   :  { %2023 = vmatprep.mubr.msk.bf16.mxu0 %vm2608_vm0, %v2607_v0  ;;  %2022 = vmatpush3.bf16.msra.mxu0 %v1199_v20 }
 0x95a   :  { %2033 = vmatprep.subr.bf16.mxu0 %v2607_v0 }
 0x992   :  { %v1188_v35 = vpop.f32.mrb[28].mxu1 }
 0x993   :  { %v2019_v16 = vpop.f32.mrb[29].mxu1 }
 0x994   :  { %v1191_v17 = vpop.f32.mrb[30].mxu1 }
 0x995   :  { %v2020_v18 = vpop.f32.mrb[31].mxu1 }
 0x996   :  { %v1851_v18 = vld [vmem:[#allocation16] ss:$0 sm:$0xff] }
 0xa24   :  { %v1288_v21 = vpop.f32.mrb[32].mxu1 }
 0xa25   :  { %v1289_v22 = vadd.f32 %v1288_v21, %v3008_v44  ;;  %v2031_v23 = vpop.f32.mrb[33].mxu1  ;;  %v1295_v44 = vpop.permute.xlu1 %1294 }
 0xa26   :  { %v1291_v24 = vpop.f32.mrb[34].mxu1 }
 0xa27   :  { %v2032_v25 = vpop.f32.mrb[35].mxu1  ;;  %v1344_v27 = vsel %vm544_vm5, %v1289_v22, -inf }
 0xa28   :  { %1345 = vmax.xlane.f32.xlu0 %v1344_v27 }
 0xa2b   :  { %v1142_v30 = vpop.f32.mrb[28].mxu0 }
 0xa2c   :  { %v1194_v31 = vpack.c.bf16 %v1188_v35, %v1142_v30  ;;  %v2013_v32 = vpop.f32.mrb[29].mxu0 }
 0xa2d   :  { %v1145_v33 = vpop.f32.mrb[30].mxu0 }
 0xa2e   :  { %v2014_v37 = vpop.f32.mrb[31].mxu0  ;;  %2024 = vmatmul.mubr.msk.bf16.vlgmr.msra.gmra.mrb[32].mxu0 %vm451_vm2, %v1194_v31 }
 0xa2f   :  { %2034 = vmatpush3.bf16.xpose.msra.mxu0 %v1302_v36  ;;  %2035 = vmatprep.mubr.msk.bf16.mxu0 %vm2608_vm0, %v2607_v0 }
 0xa30   :  { %2045 = vmatprep.subr.bf16.mxu0 %v2607_v0 }
 0xa36   :  { %2036 = vmatmul.mubr.msk.bf16.vlgmr.msra.gmra.mrb[36].mxu0 %vm451_vm2, %v1295_v44 }
 0xa37   :  { %2047 = vmatprep.mubr.msk.bf16.mxu0 %vm2608_vm0, %v2607_v0 }
 0xab5   :  { %v1346_v38 = vpop.xlane.xlu0 %1345 }
 0xab6   :  { %v1350_v39 = vsub.f32 %v1289_v22, %v1346_v38 }
 0xab8   :  { %v1352_v40 = vmul.f32 1.442695, %v1350_v39 }
 0xaba   :  { %2144 = vpow2.f32 %v1352_v40 }
 0xac4   :  { %v2145_v41 = vpop.eup %2144 }
 0xac5   :  { %v1356_v42 = vsel %vm544_vm5, %v2145_v41, 0.0 }
 0xac6   :  { %1357 = vadd.xlane.f32.xlu0 %v1356_v42  ;;  %v2114_v42 = vld [vmem:[#allocation20] sm:$0xff]  }
 0xb01   :  { %v1235_v43 = vpop.f32.mrb[32].mxu0 }
 0xb02   :  { %v1242_v46 = vadd.f32 %v1235_v43, %v3103_v48  ;;  %v2025_v47 = vpop.f32.mrb[33].mxu0  ;;  %v2116_v43 = vld [vmem:[#allocation23] sm:$0xff]  }
 0xb03   :  { %v1238_v49 = vpop.f32.mrb[34].mxu0 }
 0xb04   :  { %v1243_v50 = vadd.f32 %v1238_v49, %v3105_v51  ;;  %v2026_v52 = vpop.f32.mrb[35].mxu0 }
 0xb09   :  { %v1338_v53 = vpop.f32.mrb[36].mxu0 }
 0xb0a   :  { %v1339_v54 = vadd.f32 %v1338_v53, %v3010_v45  ;;  %v2037_v34 = vpop.f32.mrb[37].mxu0 }
 0xb0b   :  { %v1341_v55 = vpop.f32.mrb[38].mxu0 }
 0xb0c   :  { %v2038_v56 = vpop.f32.mrb[39].mxu0  ;;  %v1347_v57 = vsel %vm544_vm5, %v1339_v54, -inf }
 0xb0d   :  { %1348 = vmax.xlane.f32.xlu1 %v1347_v57 }
 0xb1e   :  { %1414 = vrot.lane.b32.xlu1 %v2979_v26, %s2615_s28 }
 0xb53   :  { %v1358_v61 = vpop.xlane.xlu0 %1357 }
 0xb9a   :  { %v1349_v58 = vpop.xlane.xlu1 %1348 }
 0xb9b   :  { %v1351_v59 = vsub.f32 %v1339_v54, %v1349_v58 }
 0xb9d   :  { %v1354_v48 = vmul.f32 1.442695, %v1351_v59 }
 0xb9e   :  { %v1415_v60 = vpop.permute.xlu1 %1414 }
 0xb9f   :  { %2146 = vpow2.f32 %v1354_v48  ;;  %2046 = vmatpush3.bf16.msra.mxu0 %v1415_v60 }
 0xba0   :  { %2057 = vmatprep.subr.bf16.mxu0 %v2607_v0  ;;  %2148 = vrcp.f32 %v1358_v61  ;;  %v1852_v61 = vld [vmem:[#allocation17] ss:$0 sm:$0xff] }
 0xba9   :  { %v2147_v51 = vpop.eup %2146 }
 0xbaa   :  { %v1359_v45 = vsel %vm544_vm5, %v2147_v51, 0.0  ;;  %v2149_v62 = vpop.eup %2148 }
 0xbab   :  { %1360 = vadd.xlane.f32.xlu0 %v1359_v45  ;;  %v1364_v26 = vmul.f32 %v2149_v62, %v2145_v41 }
 0xbad   :  { %v1366_v2 = vpack.c.bf16 %v1364_v26, %v1364_v26 }
 0xbc1   :  { %1368 = vrot.lane.b32.xlu0 %v2981_v28, %s2615_s28  ;;  %v450_v28 = vld [vmem:[#allocation14 + $0xc] sm:$0xf] }
 0xbc2   :  { %v1465_v6 = vsel %vm886_vm6, %v450_v28, 0 }
 0xc38   :  { %v1361_v63 = vpop.xlane.xlu0 %1360 }
 0xc39   :  { %2150 = vrcp.f32 %v1361_v63 }
 0xc3c   :  { %v1369_v1 = vpop.permute.xlu0 %1368 }
 0xc3d   :  { %2040 = vmatpush3.bf16.msra.mxu1 %v1369_v1 }
 0xc3e   :  { %2051 = vmatprep.subr.bf16.mxu1 %v2607_v0 }
 0xc40   :  { %2042 = vmatmul.mubr.msk.bf16.vlgmr.msra.gmra.mrb[36].mxu1 %vm544_vm5, %v1366_v2 }
 0xc41   :  { %2053 = vmatprep.mubr.msk.bf16.mxu1 %vm2608_vm0, %v2607_v0  ;;  %2052 = vmatpush3.bf16.msra.mxu1 %v1465_v6 }
 0xc42   :  { %2065 = vmatprep.subr.bf16.mxu1 %v2607_v0 }
 0xc43   :  { %v2151_v3 = vpop.eup %2150 }
 0xc44   :  { %v1365_v4 = vmul.f32 %v2151_v3, %v2147_v51  ;;  %v1853_v3 = vld [vmem:[#allocation19] ss:$0 sm:$0xff] }
 0xc46   :  { %v1367_v5 = vpack.c.bf16 %v1365_v4, %v1365_v4 }
 0xc48   :  { %2048 = vmatmul.mubr.msk.bf16.vlgmr.msra.gmra.mrb[40].mxu0 %vm544_vm5, %v1367_v5 }
 0xc49   :  { %2061 = vmatprep.mubr.msk.bf16.mxu0 %vm2608_vm0, %v2607_v0  ;;  %2058 = vmatpush3.bf16.msra.mxu0 %v2114_v42 }
 0xc4a   :  { %2059 = vmatprep.subr.bf16.mxu0 %v2607_v0 }
 0xd13   :  { %v1408_v7 = vpop.f32.mrb[36].mxu1 }
 0xd14   :  { %v2043_v8 = vpop.f32.mrb[37].mxu1 }
 0xd15   :  { %v1411_v9 = vpop.f32.mrb[38].mxu1  ;;  %v2119_v8 = vld [vmem:[#allocation23 + $0x18] sm:$0xff]  }
 0xd16   :  { %v2044_v12 = vpop.f32.mrb[39].mxu1  ;;  %v1854_v9 = vld [vmem:[#allocation22] ss:$0 sm:$0xff] }
 0xd1b   :  { %v1454_v13 = vpop.f32.mrb[40].mxu0 }
 0xd1c   :  { %v1460_v14 = vpack.c.bf16 %v1454_v13, %v1408_v7  ;;  %v2049_v15 = vpop.f32.mrb[41].mxu0  ;;  %v2118_v7 = vld [vmem:[#allocation23 + $0x10] sm:$0xff]  }
 0xd1d   :  { %v1457_v35 = vpop.f32.mrb[42].mxu0 }
 0xd1e   :  { %v2050_v16 = vpop.f32.mrb[43].mxu0  ;;  %2054 = vmatmul.mubr.msk.bf16.vlgmr.msra.gmra.mrb[40].mxu1 %vm451_vm2, %v1460_v14 }
 0xd1f   :  { %2073 = vmatprep.mubr.msk.bf16.mxu1 %vm2608_vm0, %v2607_v0  ;;  %2066 = vmatpush3.bf16.msra.mxu1 %v2116_v43 }
 0xd20   :  { %2067 = vmatprep.subr.bf16.mxu1 %v2607_v0 }
 0xdf1   :  { %v1501_v17 = vpop.f32.mrb[40].mxu1 }
 0xdf2   :  { %v1508_v19 = vadd.f32 %v1501_v17, %v1242_v46  ;;  %v2055_v20 = vpop.f32.mrb[41].mxu1  ;;  %v2117_v46 = vld [vmem:[#allocation23 + $0x8] sm:$0xff]  }
 0xdf3   :  { %v1504_v21 = vpop.f32.mrb[42].mxu1  ;;  %2068 = vmatpush3.bf16.msra.mxu1 %v2117_v46  ;;  %v1858_v20 = vld [vmem:[#allocation25] ss:$0 sm:$0xff] }
 0xdf4   :  { %v1517_v22 = vadd.f32 %v1851_v18, %v1508_v19  ;;  %v1509_v23 = vadd.f32 %v1504_v21, %v1243_v50  ;;  %v2056_v24 = vpop.f32.mrb[43].mxu1  ;;  %2069 = vmatprep.subr.bf16.mxu1 %v2607_v0 }
 0xdf6   :  { %v1518_v25 = vadd.f32 %v1851_v18, %v1509_v23  ;;  %v1519_v27 = vadd.f32 %v1517_v22, %v2964_v10 }
 0xdf7   :  { %2070 = vmatpush3.bf16.msra.mxu1 %v2118_v7 }
 0xdf8   :  { %v1523_v29 = vsel %vm302_vm1, %v1519_v27, 0.0  ;;  %v1520_v30 = vadd.f32 %v1518_v25, %v2966_v11  ;;  %v2115_v11 = vld [vmem:[#allocation20 + $0x8] sm:$0xff]   ;;  %2071 = vmatprep.subr.bf16.mxu1 %v2607_v0 }
 0xdf9   :  { %1524 = vadd.xlane.f32.xlu1 %v1523_v29  ;;  %2060 = vmatpush3.bf16.msra.mxu0 %v2115_v11 }
 0xdfa   :  { %v1526_v31 = vsel %vm302_vm1, %v1520_v30, 0.0 }
 0xdfb   :  { %1527 = vadd.xlane.f32.xlu0 %v1526_v31  ;;  %2072 = vmatpush3.bf16.msra.mxu1 %v2119_v8 }
 0xe86   :  { %v1525_v32 = vpop.xlane.xlu1 %1524 }
 0xe87   :  { %v1530_v33 = vmul.f32 0.03125, %v1525_v32 }
 0xe88   :  { %v1528_v36 = vpop.xlane.xlu0 %1527 }
 0xe89   :  { %v1532_v37 = vsub.f32 %v1519_v27, %v1530_v33  ;;  %v1531_v44 = vmul.f32 0.03125, %v1528_v36 }
 0xe8b   :  { %v1533_v38 = vsub.f32 %v1520_v30, %v1531_v44  ;;  %v1534_v39 = vmul.f32 %v1532_v37, %v1532_v37  ;;  %v1568_v63 = vmul.f32 %v1852_v61, %v1532_v37 }
 0xe8d   :  { %v1536_v40 = vsel %vm302_vm1, %v1534_v39, 0.0  ;;  %v1535_v41 = vmul.f32 %v1533_v38, %v1533_v38  ;;  %v1569_v26 = vmul.f32 %v1852_v61, %v1533_v38 }
 0xe8e   :  { %1537 = vadd.xlane.f32.xlu0 %v1536_v40 }
 0xe8f   :  { %v1539_v10 = vsel %vm302_vm1, %v1535_v41, 0.0 }
 0xe90   :  { %1540 = vadd.xlane.f32.xlu1 %v1539_v10 }
 0xf1b   :  { %v1538_v47 = vpop.xlane.xlu0 %1537 }
 0xf1c   :  { %v1542_v49 = vmul.f32 0.032258064, %v1538_v47 }
 0xf1d   :  { %v1541_v50 = vpop.xlane.xlu1 %1540 }
 0xf1e   :  { %2152 = vrsqrt.f32 %v1542_v49  ;;  %v1543_v52 = vmul.f32 0.032258064, %v1541_v50  ;;  %vm1546_vm7 = vcmp.eq.f32.partialorder %v1542_v49, inf  ;;  %v1549_v34 = vand.u32 2147483648, %v1542_v49 }
 0xf1f   :  { %vm1548_vm8 = vcmp.eq.f32.partialorder %v1542_v49, 0.0 }
 0xf20   :  { %2154 = vrsqrt.f32 %v1543_v52  ;;  %vm1553_vm9 = vcmp.eq.f32.partialorder %v1543_v52, inf  ;;  %v1556_v48 = vand.u32 2147483648, %v1543_v52  ;;  %vm1555_vm10 = vcmp.eq.f32.partialorder %v1543_v52, 0.0 }
 0xf28   :  { %v2153_v53 = vpop.eup %2152 }
 0xf29   :  { %v1545_v54 = vmul.f32 %v2153_v53, %v1542_v49 }
 0xf2a   :  { %v2155_v55 = vpop.eup %2154 }
 0xf2b   :  { %v1547_v56 = vsel %vm1546_vm7, %v1542_v49, %v1545_v54  ;;  %v1552_v58 = vmul.f32 %v2155_v55, %v1543_v52 }
 0xf2c   :  { %v1550_v57 = vsel %vm1548_vm8, %v1549_v34, %v1547_v56 }
 0xf2d   :  { %v1558_v59 = vadd.f32 1e-06, %v1550_v57  ;;  %v1554_v60 = vsel %vm1553_vm9, %v1543_v52, %v1552_v58 }
 0xf2e   :  { %v1557_v51 = vsel %vm1555_vm10, %v1556_v48, %v1554_v60  ;;  %v1864_v48 = vld [vmem:[#allocation26] ss:$0 sm:$0xff] }
 0xf2f   :  { %2156 = vrcp.f32 %v1558_v59  ;;  %v1559_v45 = vadd.f32 1e-06, %v1557_v51 }
 0xf31   :  { %2158 = vrcp.f32 %v1559_v45  ;;  %v1865_v45 = vld [vmem:[#allocation28] ss:$0 sm:$0xff] }
 0xf39   :  { %v2157_v62 = vpop.eup %2156 }
 0xf3a   :  { %v1570_v1 = vmul.f32 %v2157_v62, %v1568_v63 }
 0xf3b   :  { %v2159_v2 = vpop.eup %2158 }
 0xf3c   :  { %v1571_v4 = vmul.f32 %v2159_v2, %v1569_v26  ;;  %v1578_v5 = vadd.f32 %v1853_v3, %v1570_v1 }
 0xf3e   :  { %v1579_v28 = vadd.f32 %v1853_v3, %v1571_v4 }
 0xf40   :  { %v1580_v6 = vpack.c.bf16 %v1579_v28, %v1578_v5 }
 0xf42   :  { %2062 = vmatmul.mubr.msk.bf16.vlgmr.msra.gmra.mrb[44].mxu0 %vm302_vm1, %v1580_v6 }
0x1015   :  { %v1641_v12 = vpop.f32.mrb[44].mxu0 }
0x1016   :  { %v1642_v13 = vadd.f32 %v1854_v9, %v1641_v12  ;;  %v2063_v14 = vpop.f32.mrb[45].mxu0 }
0x1017   :  { %v1644_v15 = vpop.f32.mrb[46].mxu0 }
0x1018   :  { %v1645_v35 = vadd.f32 %v1854_v9, %v1644_v15  ;;  %v2064_v16 = vpop.f32.mrb[47].mxu0  ;;  %v1648_v17 = vmax.f32 %v1642_v13, 0.0 }
0x101a   :  { %v1649_v18 = vmax.f32 %v1645_v35, 0.0 }
0x101c   :  { %v1650_v19 = vpack.c.bf16 %v1649_v18, %v1648_v17 }
0x101e   :  { %2074 = vmatmul.mubr.msk.bf16.vlgmr.msra.gmra.mrb[44].mxu1 %vm1690_vm11, %v1650_v19 }
0x10f1   :  { %v1728_v21 = vpop.f32.mrb[44].mxu1 }
0x10f2   :  { %v1729_v22 = vadd.f32 %v1858_v20, %v1728_v21  ;;  %v2075_v23 = vpop.f32.mrb[45].mxu1 }
0x10f3   :  { %v1731_v24 = vpop.f32.mrb[46].mxu1 }
0x10f4   :  { %v1732_v0 = vadd.f32 %v1858_v20, %v1731_v24  ;;  %v2076_v25 = vpop.f32.mrb[47].mxu1  ;;  %v1735_v27 = vadd.f32 %v1729_v22, %v1578_v5 }
0x10f6   :  { %v1739_v29 = vsel %vm302_vm1, %v1735_v27, 0.0  ;;  %v1736_v30 = vadd.f32 %v1732_v0, %v1579_v28 }
0x10f7   :  { %1740 = vadd.xlane.f32.xlu0 %v1739_v29 }
0x10f8   :  { %v1742_v31 = vsel %vm302_vm1, %v1736_v30, 0.0 }
0x10f9   :  { %1743 = vadd.xlane.f32.xlu1 %v1742_v31 }
0x1184   :  { %v1741_v32 = vpop.xlane.xlu0 %1740 }
0x1185   :  { %v1745_v33 = vmul.f32 0.03125, %v1741_v32 }
0x1186   :  { %v1744_v36 = vpop.xlane.xlu1 %1743 }
0x1187   :  { %v1747_v37 = vsub.f32 %v1735_v27, %v1745_v33  ;;  %v1746_v44 = vmul.f32 0.03125, %v1744_v36 }
0x1189   :  { %v1748_v38 = vsub.f32 %v1736_v30, %v1746_v44  ;;  %v1749_v39 = vmul.f32 %v1747_v37, %v1747_v37  ;;  %v1783_v60 = vmul.f32 %v1864_v48, %v1747_v37 }
0x118b   :  { %v1751_v40 = vsel %vm302_vm1, %v1749_v39, 0.0  ;;  %v1750_v41 = vmul.f32 %v1748_v38, %v1748_v38  ;;  %v1784_v62 = vmul.f32 %v1864_v48, %v1748_v38 }
0x118c   :  { %1752 = vadd.xlane.f32.xlu0 %v1751_v40 }
0x118d   :  { %v1754_v10 = vsel %vm302_vm1, %v1750_v41, 0.0 }
0x118e   :  { %1755 = vadd.xlane.f32.xlu1 %v1754_v10 }
0x1219   :  { %v1753_v42 = vpop.xlane.xlu0 %1752 }
0x121a   :  { %v1757_v11 = vmul.f32 0.032258064, %v1753_v42 }
0x121b   :  { %v1756_v43 = vpop.xlane.xlu1 %1755 }
0x121c   :  { %2160 = vrsqrt.f32 %v1757_v11  ;;  %v1758_v46 = vmul.f32 0.032258064, %v1756_v43  ;;  %vm1761_vm12 = vcmp.eq.f32.partialorder %v1757_v11, inf  ;;  %v1764_v50 = vand.u32 2147483648, %v1757_v11 }
0x121d   :  { %vm1763_vm13 = vcmp.eq.f32.partialorder %v1757_v11, 0.0 }
0x121e   :  { %2162 = vrsqrt.f32 %v1758_v46  ;;  %vm1768_vm14 = vcmp.eq.f32.partialorder %v1758_v46, inf  ;;  %v1771_v56 = vand.u32 2147483648, %v1758_v46  ;;  %vm1770_vm15 = vcmp.eq.f32.partialorder %v1758_v46, 0.0 }
0x1226   :  { %v2161_v47 = vpop.eup %2160 }
0x1227   :  { %v1760_v49 = vmul.f32 %v2161_v47, %v1757_v11 }
0x1228   :  { %v2163_v52 = vpop.eup %2162 }
0x1229   :  { %v1762_v53 = vsel %vm1761_vm12, %v1757_v11, %v1760_v49  ;;  %v1767_v34 = vmul.f32 %v2163_v52, %v1758_v46 }
0x122a   :  { %v1765_v54 = vsel %vm1763_vm13, %v1764_v50, %v1762_v53 }
0x122b   :  { %v1773_v55 = vadd.f32 1e-06, %v1765_v54  ;;  %v1769_v57 = vsel %vm1768_vm14, %v1758_v46, %v1767_v34 }
0x122c   :  { %v1772_v58 = vsel %vm1770_vm15, %v1771_v56, %v1769_v57 }
0x122d   :  { %2164 = vrcp.f32 %v1773_v55  ;;  %v1774_v59 = vadd.f32 1e-06, %v1772_v58 }
0x122f   :  { %2166 = vrcp.f32 %v1774_v59 }
0x1237   :  { %v2165_v51 = vpop.eup %2164 }
0x1238   :  { %v1785_v61 = vmul.f32 %v2165_v51, %v1783_v60 }
0x1239   :  { %v2167_v63 = vpop.eup %2166 }
0x123a   :  { %v1793_v26 = vadd.f32 %v1865_v45, %v1785_v61  ;;  %v1786_v1 = vmul.f32 %v2167_v63, %v1784_v62 }
0x123c   :  { %1795 = vst.msk [vmem:[#allocation29] sm:$0xff] %vm302_vm1, %v1793_v26  ;;  %v1794_v2 = vadd.f32 %v1865_v45, %v1786_v1 }
0x123e   :  { %1796 = vst.msk [vmem:[#allocation29 + $0x8] sm:$0xff] %vm302_vm1, %v1794_v2 }
0x123f   :  { %2553 = shalt.err (!%p2550_p0)
}
0x1240   :  { %s3224_s4 = sld [smem:[#allocation42_spill]] }
0x1246   :  { %s2554_s27 = scalar_lea.hbm %s3224_s4, 256 }
0x1247   :  { %p2555_p1 = scmp.ne.s32.totalorder %s3224_s4, %s2554_s27  ;;  %p2558_p2 = scmp.lt.u32.totalorder %s2554_s27, %s3224_s4 }
0x1249   :  { %p2560_p3 = pnand %p2558_p2, %p2555_p1 }
0x124b   :  { %2563 = shalt.err (!%p2560_p3)
}
0x124c   :  { %1808 = dma.vmem_to_hbm [thread:$0]  %s1803_s20, 256, %s3224_s4, [#allocation4], %s3223_s17, %s3223_s17, %s3222_s7  }
0x124d   :  { %2582 = dma.done.wait [#allocation4], 256  }
0x124e   :  { %2583 = vsyncadd [#allocation4], 4294967040 }
0x124f   :  { %1812 = vsyncpa [#allocation3], 1 }
0x1250   :  { %1813 = vsyncpa [#allocation6], 1 }
0x1251   :  { %1814 = vsyncpa [#allocation9], 1 }
0x1252   :  { %1815 = vsyncpa [#allocation12], 1 }
0x1253   :  { %1816 = vsyncpa [#allocation15], 1 }
0x1254   :  { %1817 = vsyncpa [#allocation18], 1 }
0x1255   :  { %1818 = vsyncpa [#allocation21], 1 }
0x1256   :  { %1819 = vsyncpa [#allocation24], 1 }
0x1257   :  { %1820 = vsyncpa [#allocation27], 1 }
0x1258   :  { %1821 = vsyncpa [#allocation4], 1 }

</bundles_post_ra>
